<compile_context>
chip_gen: v7x
topology: tpu7x:2x2x1
jax: 0.10.0
libtpu: 0.0.40
codegen_flags: <defaults>
</compile_context>

<pallas_src>
import functools

import jax
import jax.numpy as jnp
from jax.experimental import pallas as pl
from jax.experimental.pallas import tpu as pltpu


# ---------------------------------------------------------------------------
# Kernel: cross-attn K/V + softmax + out-proj, FFN + residual, LayerNorm,
#         final (lane-padded) projection -- for a block of Bt batch elements.
# ---------------------------------------------------------------------------
def qformer_kernel(
    x_ref,       # (Bt*S, H)  bf16   streaming input rows
    qca_ref,     # (Q, H)     bf16   pre-scaled cross-attn query projection
    wk_ref,      # (H, H)     bf16
    wv_ref,      # (H, H)     bf16
    wo_ref,      # (H, H)     bf16
    w1_ref,      # (H, 3H)    bf16
    w2_ref,      # (3H, H)    bf16
    wf_ref,      # (H, Dpad)  bf16   fc_out, lane-padded
    biasH_ref,   # (8, H)     f32    rows: bk, bv, bo, b2, ln_g, ln_b, 0, 0
    b1_ref,      # (1, 3H)    f32
    bf_ref,      # (1, Dpad)  f32
    out_ref,     # (Bt*Q, Dpad) f32
    *, seq_len,
):
    rows, H = x_ref.shape
    S = seq_len
    Bt = rows // S
    Q = qca_ref.shape[0]
    f32 = jnp.float32
    bf16 = jnp.bfloat16

    bias = biasH_ref[...]
    bk, bv, bo, b2, ln_g, ln_b = (bias[i:i + 1, :] for i in range(6))

    x = x_ref[...]          # (Bt*S, H) bf16
    q = qca_ref[...]        # (Q, H)    bf16, 1/sqrt(H) already folded in

    # Cross-attn K/V projections as single slab matmuls over the whole block.
    k = jnp.dot(x, wk_ref[...], preferred_element_type=f32) + bk
    v = jnp.dot(x, wv_ref[...], preferred_element_type=f32) + bv
    k = k.astype(bf16).reshape(Bt, S, H)
    v = v.astype(bf16).reshape(Bt, S, H)

    # Batched scaled-dot-product attention (scale folded into q).
    q3 = jnp.broadcast_to(q, (Bt, Q, H))
    s = jnp.einsum("bqh,bsh->bqs", q3, k, preferred_element_type=f32)   # (Bt,Q,S)
    s = s - jnp.max(s, axis=-1, keepdims=True)
    p = jnp.exp(s)
    p = p * pl.reciprocal(jnp.sum(p, axis=-1, keepdims=True), approx=True)
    attn = jnp.einsum("bqs,bsh->bqh", p.astype(bf16), v,
                      preferred_element_type=f32)                       # (Bt,Q,H)
    attn = attn.reshape(Bt * Q, H).astype(bf16)

    # Cross-attention output projection.
    ca = jnp.dot(attn, wo_ref[...], preferred_element_type=f32) + bo    # (Bt*Q, H) f32

    # Feed-forward + residual (Dropout is identity in inference semantics).
    h = jnp.dot(ca.astype(bf16), w1_ref[...], preferred_element_type=f32) + b1_ref[...]
    h = jnp.maximum(h, 0.0)
    y = jnp.dot(h.astype(bf16), w2_ref[...], preferred_element_type=f32) + b2 + ca

    # LayerNorm over hidden dim (eps = 1e-5, PyTorch default) in f32.
    mu = jnp.mean(y, axis=-1, keepdims=True)
    var = jnp.mean((y - mu) ** 2, axis=-1, keepdims=True)
    yn = (y - mu) * jax.lax.rsqrt(var + 1e-5) * ln_g + ln_b

    # Final projection to (lane-padded) query_dim -- lane-dense store.
    out = jnp.dot(yn.astype(bf16), wf_ref[...], preferred_element_type=f32) + bf_ref[...]
    out_ref[...] = out.astype(out_ref.dtype)


# ---------------------------------------------------------------------------
# One-time parameter preparation: weight transposes, QKV pre-split, bf16 cast,
# bias packing, fc_out lane padding, and the batch-invariant precompute.
# ---------------------------------------------------------------------------
def prepare_params(params):
    H = params["qemb"].shape[1]
    D = params["wf"].shape[0]
    Dpad = max(128, ((D + 127) // 128) * 128)
    scale = 1.0 / jnp.sqrt(jnp.float32(H))          # num_heads = 1 -> head_dim = H
    qemb = params["qemb"]

    # --- batch-invariant self-attention over the learned queries (f32) ---
    wq, wk, wv = jnp.split(params["sa_wqkv"], 3, axis=0)
    bq, bk, bv = jnp.split(params["sa_bqkv"], 3)
    q = qemb @ wq.T + bq
    k = qemb @ wk.T + bk
    v = qemb @ wv.T + bv
    p = jax.nn.softmax((q @ k.T) * scale, axis=-1)
    sa_out = (p @ v) @ params["sa_wo"].T + params["sa_bo"]            # (Q, H)

    # --- batch-invariant cross-attn query projection, softmax scale folded ---
    ca_wq, ca_wk, ca_wv = jnp.split(params["ca_wqkv"], 3, axis=0)
    ca_bq, ca_bk, ca_bv = jnp.split(params["ca_bqkv"], 3)
    q_ca = (sa_out @ ca_wq.T + ca_bq) * scale                          # (Q, H)

    # Pack the eight H-width bias / LayerNorm vectors into one (8, H) slab.
    biasH = jnp.zeros((8, H), jnp.float32)
    biasH = (biasH.at[0].set(ca_bk)
                  .at[1].set(ca_bv)
                  .at[2].set(params["ca_bo"])
                  .at[3].set(params["b2"])
                  .at[4].set(params["ln_g"])
                  .at[5].set(params["ln_b"]))

    # fc_out: pad output lanes to a multiple of 128 for lane-dense stores.
    wf_pad = jnp.zeros((H, Dpad), jnp.float32).at[:, :D].set(params["wf"].T)
    bf_pad = jnp.zeros((1, Dpad), jnp.float32).at[:, :D].set(params["bf"])

    bf16 = jnp.bfloat16
    return {
        "q_ca": q_ca.astype(bf16),
        "wk": ca_wk.T.astype(bf16),
        "wv": ca_wv.T.astype(bf16),
        "wo": params["ca_wo"].T.astype(bf16),
        "w1": params["w1"].T.astype(bf16),
        "w2": params["w2"].T.astype(bf16),
        "wf": wf_pad.astype(bf16),
        "biasH": biasH,
        "b1": params["b1"][None, :],
        "bf": bf_pad,
    }


# ---------------------------------------------------------------------------
# Generation-aware block / VMEM sizing.
# ---------------------------------------------------------------------------
def _vmem_capacity_bytes():
    try:
        info = pltpu.get_tpu_info()
        cap = getattr(info, "vmem_capacity_bytes", None)
        if cap:
            return int(cap)
    except Exception:
        pass
    return 64 * 1024 * 1024          # conservative (v7x per-core VMEM)


def _estimate_vmem_bytes(block_b, S, H, Q, Dpad):
    bf, f32 = 2, 4
    x_blk = block_b * S * H * bf * 2                   # double-buffered input block
    out_blk = block_b * Q * Dpad * f32 * 2             # double-buffered output block
    kv = block_b * S * H * (f32 + bf) * 2              # k, v (f32 accum + bf16 copy)
    rows = block_b * Q
    inter = rows * (S * f32 + 4 * H * f32 + 2 * 3 * H * f32 + Dpad * f32)
    weights = (9 * H * H + H * Dpad + Q * H) * bf + (8 * H + 3 * H + Dpad) * f32
    return x_blk + out_blk + kv + inter + weights


def _pick_block_b(B, S, H, Q, Dpad, vmem_limit):
    budget = int(vmem_limit * 0.8)

    def aligned(bb):
        ok_x = (bb * S) % 8 == 0 or bb == B
        ok_o = (bb * Q) % 8 == 0 or bb == B
        return ok_x and ok_o

    divisors = [d for d in range(1, B + 1) if B % d == 0]
    cands = [d for d in divisors
             if aligned(d) and _estimate_vmem_bytes(d, S, H, Q, Dpad) <= budget]
    if not cands:
        cands = [d for d in divisors if aligned(d)] or [B]
    # Fill the 256-row MXU (v6e/v7x; also a multiple of 128 for v5e) on the
    # post-attention matmul chain, but keep as many grid steps as possible for
    # DMA/compute overlap (smallest block that meets the row target).
    row_target = 256
    meets = [d for d in cands if d * Q >= row_target]
    return min(meets) if meets else max(cands)


# ---------------------------------------------------------------------------
# Wrapper
# ---------------------------------------------------------------------------
def qformer_forward(x, prepped, out_dim, *, block_b=None):
    """x: (B, S, H) float32; prepped: prepare_params() output. Returns (B, Q, D)."""
    B, S, H = x.shape
    Q = prepped["q_ca"].shape[0]
    Dpad = prepped["wf"].shape[1]
    D = out_dim

    vmem_cap = _vmem_capacity_bytes()
    vmem_limit = min(max(32 * 1024 * 1024, int(vmem_cap * 0.75)), 100 * 1024 * 1024)

    if block_b is None:
        block_b = _pick_block_b(B, S, H, Q, Dpad, vmem_limit)
    assert B % block_b == 0, "batch must be divisible by block_b"
    grid = (B // block_b,)

    weight_names = ["q_ca", "wk", "wv", "wo", "w1", "w2", "wf", "biasH", "b1", "bf"]
    weights = [prepped[n] for n in weight_names]

    # Wrapper-side reshape of contiguous dims (free) + bf16 cast for the MXU.
    x2 = x.reshape(B * S, H).astype(jnp.bfloat16)

    def build(single_buffer_weights):
        def full_spec(arr):
            nd = arr.ndim
            if single_buffer_weights:
                return pl.BlockSpec(arr.shape, lambda b, _nd=nd: (0,) * _nd,
                                    pipeline_mode=pl.Buffered(1))
            return pl.BlockSpec(arr.shape, lambda b, _nd=nd: (0,) * _nd)

        in_specs = ([pl.BlockSpec((block_b * S, H), lambda b: (b, 0))]
                    + [full_spec(w) for w in weights])
        out_spec = pl.BlockSpec((block_b * Q, Dpad), lambda b: (b, 0))

        return pl.pallas_call(
            functools.partial(qformer_kernel, seq_len=S),
            out_shape=jax.ShapeDtypeStruct((B * Q, Dpad), jnp.float32),
            grid=grid,
            in_specs=in_specs,
            out_specs=out_spec,
            compiler_params=pltpu.CompilerParams(
                dimension_semantics=("parallel",),
                vmem_limit_bytes=vmem_limit,
            ),
        )

    try:
        out2 = build(True)(x2, *weights)
    except Exception:
        # Fallback: default double-buffering if Buffered(1) is rejected.
        out2 = build(False)(x2, *weights)

    return out2[:, :D].reshape(B, Q, D)


# ---------------------------------------------------------------------------
# Pure-JAX reference (straight port of the PyTorch module, f32)
# ---------------------------------------------------------------------------
def qformer_reference(x, params):
    B, S, H = x.shape
    Q = params["qemb"].shape[0]
    queries = jnp.broadcast_to(params["qemb"][None], (B, Q, H))

    def mha(q_in, kv_in, wqkv, bqkv, wo, bo):
        wq, wk, wv = wqkv[:H], wqkv[H:2 * H], wqkv[2 * H:]
        bq, bk, bv = bqkv[:H], bqkv[H:2 * H], bqkv[2 * H:]
        q = jnp.einsum("bqh,oh->bqo", q_in, wq) + bq
        k = jnp.einsum("bsh,oh->bso", kv_in, wk) + bk
        v = jnp.einsum("bsh,oh->bso", kv_in, wv) + bv
        s = jnp.einsum("bqh,bkh->bqk", q, k) / jnp.sqrt(jnp.float32(H))
        p = jax.nn.softmax(s, axis=-1)
        o = jnp.einsum("bqk,bkh->bqh", p, v)
        return jnp.einsum("bqh,oh->bqo", o, wo) + bo

    sa = mha(queries, queries, params["sa_wqkv"], params["sa_bqkv"],
             params["sa_wo"], params["sa_bo"])
    ca = mha(sa, x, params["ca_wqkv"], params["ca_bqkv"],
             params["ca_wo"], params["ca_bo"])
    h = jax.nn.relu(jnp.einsum("bqh,oh->bqo", ca, params["w1"]) + params["b1"])
    ff = jnp.einsum("bqh,oh->bqo", h, params["w2"]) + params["b2"]
    y = ff + ca
    mu = jnp.mean(y, axis=-1, keepdims=True)
    var = jnp.mean((y - mu) ** 2, axis=-1, keepdims=True)
    yn = (y - mu) * jax.lax.rsqrt(var + 1e-5) * params["ln_g"] + params["ln_b"]
    return jnp.einsum("bqh,oh->bqo", yn, params["wf"]) + params["bf"]


# ---------------------------------------------------------------------------
# Deterministic parameter init (shapes match the nn.Module __init__)
# ---------------------------------------------------------------------------
def init_params(key, hidden_dim, query_dim, num_queries):
    H, D, Q = hidden_dim, query_dim, num_queries
    ks = jax.random.split(key, 16)
    rn = lambda k, shape, s=0.1: jax.random.normal(k, shape, dtype=jnp.float32) * s
    return {
        "qemb":    rn(ks[0], (Q, H), 1.0),
        "sa_wqkv": rn(ks[1], (3 * H, H)),
        "sa_bqkv": rn(ks[2], (3 * H,)),
        "sa_wo":   rn(ks[3], (H, H)),
        "sa_bo":   rn(ks[4], (H,)),
        "ca_wqkv": rn(ks[5], (3 * H, H)),
        "ca_bqkv": rn(ks[6], (3 * H,)),
        "ca_wo":   rn(ks[7], (H, H)),
        "ca_bo":   rn(ks[8], (H,)),
        "w1":      rn(ks[9], (3 * H, H)),
        "b1":      rn(ks[10], (3 * H,)),
        "w2":      rn(ks[11], (H, 3 * H)),
        "b2":      rn(ks[12], (H,)),
        "ln_g":    jnp.ones((H,), jnp.float32),
        "ln_b":    jnp.zeros((H,), jnp.float32),
        "wf":      rn(ks[13], (D, H)),
        "bf":      rn(ks[14], (D,)),
    }


if __name__ == "__main__":
    B, S = 2, 8                  # batch, input sequence length
    hidden_dim = 32
    query_dim = 16
    num_queries = 4

    key = jax.random.PRNGKey(0)
    kx, kp = jax.random.split(key)
    x = jax.random.normal(kx, (B, S, hidden_dim), dtype=jnp.float32)
    params = init_params(kp, hidden_dim, query_dim, num_queries)

    # One-time parameter prep (transposes, bf16 cast, batch-invariant precompute).
    prepped = prepare_params(params)
    prepped = jax.tree_util.tree_map(jax.block_until_ready, prepped)

    out = qformer_forward(x, prepped, query_dim)
    out = jax.block_until_ready(out)

    ref = qformer_reference(x, params)
    assert out.shape == (B, num_queries, query_dim)
    # bf16 MXU inputs + approx reciprocal -> slightly looser tolerance than f32.
    assert jnp.allclose(out, ref, atol=3e-2, rtol=3e-2), "mismatch vs JAX reference"

    print("KERNEL_OK")
</pallas_src>

<mosaic_0001>
module attributes {stable_mosaic.version = 11 : i64} {
  func.func @qformer_kernel(%arg0: i32, %arg1: memref<16x32xbf16, #tpu.memory_space<vmem>>, %arg2: memref<4x32xbf16, #tpu.memory_space<vmem>>, %arg3: memref<32x32xbf16, #tpu.memory_space<vmem>>, %arg4: memref<32x32xbf16, #tpu.memory_space<vmem>>, %arg5: memref<32x32xbf16, #tpu.memory_space<vmem>>, %arg6: memref<32x96xbf16, #tpu.memory_space<vmem>>, %arg7: memref<96x32xbf16, #tpu.memory_space<vmem>>, %arg8: memref<32x128xbf16, #tpu.memory_space<vmem>>, %arg9: memref<8x32xf32, #tpu.memory_space<vmem>>, %arg10: memref<1x96xf32, #tpu.memory_space<vmem>>, %arg11: memref<1x128xf32, #tpu.memory_space<vmem>>, %arg12: memref<8x128xf32, #tpu.memory_space<vmem>>) attributes {dimension_semantics = [#tpu.dimension_semantics<parallel>], iteration_bounds = array<i64: 1>, scalar_prefetch = 0 : i64, scratch_operands = 0 : i64, tpu.core_type = #tpu.core_type<tc>, window_params = [{transform_indices = @transform_0, window_bounds = array<i64: 16, 32>}, {pipeline_mode = #tpu.pipeline_mode<synchronous>, transform_indices = @transform_1, window_bounds = array<i64: 4, 32>}, {pipeline_mode = #tpu.pipeline_mode<synchronous>, transform_indices = @transform_2, window_bounds = array<i64: 32, 32>}, {pipeline_mode = #tpu.pipeline_mode<synchronous>, transform_indices = @transform_3, window_bounds = array<i64: 32, 32>}, {pipeline_mode = #tpu.pipeline_mode<synchronous>, transform_indices = @transform_4, window_bounds = array<i64: 32, 32>}, {pipeline_mode = #tpu.pipeline_mode<synchronous>, transform_indices = @transform_5, window_bounds = array<i64: 32, 96>}, {pipeline_mode = #tpu.pipeline_mode<synchronous>, transform_indices = @transform_6, window_bounds = array<i64: 96, 32>}, {pipeline_mode = #tpu.pipeline_mode<synchronous>, transform_indices = @transform_7, window_bounds = array<i64: 32, 128>}, {pipeline_mode = #tpu.pipeline_mode<synchronous>, transform_indices = @transform_8, window_bounds = array<i64: 8, 32>}, {pipeline_mode = #tpu.pipeline_mode<synchronous>, transform_indices = @transform_9, window_bounds = array<i64: 1, 96>}, {pipeline_mode = #tpu.pipeline_mode<synchronous>, transform_indices = @transform_10, window_bounds = array<i64: 1, 128>}, {transform_indices = @transform_11, window_bounds = array<i64: 8, 128>}]} {
    %c0 = arith.constant 0 : index
    %c0_0 = arith.constant 0 : index
    %0 = vector.load %arg9[%c0, %c0_0] : memref<8x32xf32, #tpu.memory_space<vmem>>, vector<8x32xf32>
    %1 = vector.extract_strided_slice %0 {offsets = [0, 0], sizes = [1, 32], strides = [1, 1]} : vector<8x32xf32> to vector<1x32xf32>
    %2 = vector.extract_strided_slice %0 {offsets = [1, 0], sizes = [1, 32], strides = [1, 1]} : vector<8x32xf32> to vector<1x32xf32>
    %3 = vector.extract_strided_slice %0 {offsets = [2, 0], sizes = [1, 32], strides = [1, 1]} : vector<8x32xf32> to vector<1x32xf32>
    %4 = vector.extract_strided_slice %0 {offsets = [3, 0], sizes = [1, 32], strides = [1, 1]} : vector<8x32xf32> to vector<1x32xf32>
    %5 = vector.extract_strided_slice %0 {offsets = [4, 0], sizes = [1, 32], strides = [1, 1]} : vector<8x32xf32> to vector<1x32xf32>
    %6 = vector.extract_strided_slice %0 {offsets = [5, 0], sizes = [1, 32], strides = [1, 1]} : vector<8x32xf32> to vector<1x32xf32>
    %c0_1 = arith.constant 0 : index
    %c0_2 = arith.constant 0 : index
    %7 = vector.load %arg1[%c0_1, %c0_2] : memref<16x32xbf16, #tpu.memory_space<vmem>>, vector<16x32xbf16>
    %c0_3 = arith.constant 0 : index
    %c0_4 = arith.constant 0 : index
    %8 = vector.load %arg2[%c0_3, %c0_4] : memref<4x32xbf16, #tpu.memory_space<vmem>>, vector<4x32xbf16>
    %c0_5 = arith.constant 0 : index
    %c0_6 = arith.constant 0 : index
    %9 = vector.load %arg3[%c0_5, %c0_6] : memref<32x32xbf16, #tpu.memory_space<vmem>>, vector<32x32xbf16>
    %cst = arith.constant dense<0.000000e+00> : vector<16x32xf32>
    %10 = tpu.matmul %7, %9, %cst {dimension_numbers = #tpu.dot_dimension_numbers<[1], [0], [0], [1], [0, 0, 1, 1], [], []>} : vector<16x32xbf16>, vector<32x32xbf16>, vector<16x32xf32> -> vector<16x32xf32>
    %11 = vector.broadcast %1 : vector<1x32xf32> to vector<16x32xf32>
    %12 = arith.addf %10, %11 : vector<16x32xf32>
    %c0_7 = arith.constant 0 : index
    %c0_8 = arith.constant 0 : index
    %13 = vector.load %arg4[%c0_7, %c0_8] : memref<32x32xbf16, #tpu.memory_space<vmem>>, vector<32x32xbf16>
    %cst_9 = arith.constant dense<0.000000e+00> : vector<16x32xf32>
    %14 = tpu.matmul %7, %13, %cst_9 {dimension_numbers = #tpu.dot_dimension_numbers<[1], [0], [0], [1], [0, 0, 1, 1], [], []>} : vector<16x32xbf16>, vector<32x32xbf16>, vector<16x32xf32> -> vector<16x32xf32>
    %15 = vector.broadcast %2 : vector<1x32xf32> to vector<16x32xf32>
    %16 = arith.addf %14, %15 : vector<16x32xf32>
    %17 = arith.truncf %12 : vector<16x32xf32> to vector<16x32xbf16>
    %18 = vector.shape_cast %17 : vector<16x32xbf16> to vector<2x8x32xbf16>
    %19 = arith.truncf %16 : vector<16x32xf32> to vector<16x32xbf16>
    %20 = vector.shape_cast %19 : vector<16x32xbf16> to vector<2x8x32xbf16>
    %21 = vector.shape_cast %8 : vector<4x32xbf16> to vector<1x4x32xbf16>
    %22 = vector.broadcast %21 : vector<1x4x32xbf16> to vector<2x4x32xbf16>
    "tpu.trace_start"() <{level = 10 : i32, message = "bqh,bsh->bqs"}> : () -> ()
    %cst_10 = arith.constant dense<0.000000e+00> : vector<2x4x8xf32>
    %23 = tpu.matmul %22, %18, %cst_10 {dimension_numbers = #tpu.dot_dimension_numbers<[2], [2], [1], [1], [0, 0, 0, 1, 1, 1], [0], [0]>} : vector<2x4x32xbf16>, vector<2x8x32xbf16>, vector<2x4x8xf32> -> vector<2x4x8xf32>
    "tpu.trace_stop"() : () -> ()
    %cst_11 = arith.constant dense<0xFF800000> : vector<2x4xf32>
    %24 = vector.multi_reduction <maximumf>, %23, %cst_11 [2] : vector<2x4x8xf32> to vector<2x4xf32>
    %25 = vector.shape_cast %24 : vector<2x4xf32> to vector<2x4x1xf32>
    %26 = vector.broadcast %25 : vector<2x4x1xf32> to vector<2x4x8xf32>
    %27 = arith.subf %23, %26 : vector<2x4x8xf32>
    %28 = math.exp %27 : vector<2x4x8xf32>
    %cst_12 = arith.constant dense<0.000000e+00> : vector<2x4xf32>
    %29 = vector.multi_reduction <add>, %28, %cst_12 [2] : vector<2x4x8xf32> to vector<2x4xf32>
    %30 = vector.shape_cast %29 : vector<2x4xf32> to vector<2x4x1xf32>
    %31 = tpu.reciprocal %30 {approx = true} : vector<2x4x1xf32> -> vector<2x4x1xf32>
    %32 = vector.broadcast %31 : vector<2x4x1xf32> to vector<2x4x8xf32>
    %33 = arith.mulf %28, %32 : vector<2x4x8xf32>
    %34 = arith.truncf %33 : vector<2x4x8xf32> to vector<2x4x8xbf16>
    "tpu.trace_start"() <{level = 10 : i32, message = "bqs,bsh->bqh"}> : () -> ()
    %cst_13 = arith.constant dense<0.000000e+00> : vector<2x4x32xf32>
    %35 = tpu.matmul %34, %20, %cst_13 {dimension_numbers = #tpu.dot_dimension_numbers<[2], [1], [1], [2], [0, 0, 0, 1, 1, 2], [0], [0]>} : vector<2x4x8xbf16>, vector<2x8x32xbf16>, vector<2x4x32xf32> -> vector<2x4x32xf32>
    "tpu.trace_stop"() : () -> ()
    %36 = vector.shape_cast %35 : vector<2x4x32xf32> to vector<8x32xf32>
    %37 = arith.truncf %36 : vector<8x32xf32> to vector<8x32xbf16>
    %c0_14 = arith.constant 0 : index
    %c0_15 = arith.constant 0 : index
    %38 = vector.load %arg5[%c0_14, %c0_15] : memref<32x32xbf16, #tpu.memory_space<vmem>>, vector<32x32xbf16>
    %cst_16 = arith.constant dense<0.000000e+00> : vector<8x32xf32>
    %39 = tpu.matmul %37, %38, %cst_16 {dimension_numbers = #tpu.dot_dimension_numbers<[1], [0], [0], [1], [0, 0, 1, 1], [], []>} : vector<8x32xbf16>, vector<32x32xbf16>, vector<8x32xf32> -> vector<8x32xf32>
    %40 = vector.broadcast %3 : vector<1x32xf32> to vector<8x32xf32>
    %41 = arith.addf %39, %40 : vector<8x32xf32>
    %42 = arith.truncf %41 : vector<8x32xf32> to vector<8x32xbf16>
    %c0_17 = arith.constant 0 : index
    %c0_18 = arith.constant 0 : index
    %43 = vector.load %arg6[%c0_17, %c0_18] : memref<32x96xbf16, #tpu.memory_space<vmem>>, vector<32x96xbf16>
    %cst_19 = arith.constant dense<0.000000e+00> : vector<8x96xf32>
    %44 = tpu.matmul %42, %43, %cst_19 {dimension_numbers = #tpu.dot_dimension_numbers<[1], [0], [0], [1], [0, 0, 1, 1], [], []>} : vector<8x32xbf16>, vector<32x96xbf16>, vector<8x96xf32> -> vector<8x96xf32>
    %c0_20 = arith.constant 0 : index
    %c0_21 = arith.constant 0 : index
    %45 = vector.load %arg10[%c0_20, %c0_21] : memref<1x96xf32, #tpu.memory_space<vmem>>, vector<1x96xf32>
    %46 = vector.broadcast %45 : vector<1x96xf32> to vector<8x96xf32>
    %47 = arith.addf %44, %46 : vector<8x96xf32>
    %cst_22 = arith.constant 0.000000e+00 : f32
    %48 = vector.broadcast %cst_22 : f32 to vector<8x96xf32>
    %49 = arith.maximumf %47, %48 : vector<8x96xf32>
    %50 = arith.truncf %49 : vector<8x96xf32> to vector<8x96xbf16>
    %c0_23 = arith.constant 0 : index
    %c0_24 = arith.constant 0 : index
    %51 = vector.load %arg7[%c0_23, %c0_24] : memref<96x32xbf16, #tpu.memory_space<vmem>>, vector<96x32xbf16>
    %cst_25 = arith.constant dense<0.000000e+00> : vector<8x32xf32>
    %52 = tpu.matmul %50, %51, %cst_25 {dimension_numbers = #tpu.dot_dimension_numbers<[1], [0], [0], [1], [0, 0, 1, 1], [], []>} : vector<8x96xbf16>, vector<96x32xbf16>, vector<8x32xf32> -> vector<8x32xf32>
    %53 = vector.broadcast %4 : vector<1x32xf32> to vector<8x32xf32>
    %54 = arith.addf %52, %53 : vector<8x32xf32>
    %55 = arith.addf %54, %41 : vector<8x32xf32>
    %cst_26 = arith.constant dense<0.000000e+00> : vector<8xf32>
    %56 = vector.multi_reduction <add>, %55, %cst_26 [1] : vector<8x32xf32> to vector<8xf32>
    %57 = vector.shape_cast %56 : vector<8xf32> to vector<8x1xf32>
    %cst_27 = arith.constant 3.200000e+01 : f32
    %58 = vector.broadcast %cst_27 : f32 to vector<8x1xf32>
    %59 = arith.divf %57, %58 : vector<8x1xf32>
    %60 = vector.broadcast %59 : vector<8x1xf32> to vector<8x32xf32>
    %61 = arith.subf %55, %60 : vector<8x32xf32>
    %62 = arith.mulf %61, %61 : vector<8x32xf32>
    %cst_28 = arith.constant dense<0.000000e+00> : vector<8xf32>
    %63 = vector.multi_reduction <add>, %62, %cst_28 [1] : vector<8x32xf32> to vector<8xf32>
    %64 = vector.shape_cast %63 : vector<8xf32> to vector<8x1xf32>
    %cst_29 = arith.constant 3.200000e+01 : f32
    %65 = vector.broadcast %cst_29 : f32 to vector<8x1xf32>
    %66 = arith.divf %64, %65 : vector<8x1xf32>
    %67 = vector.broadcast %59 : vector<8x1xf32> to vector<8x32xf32>
    %68 = arith.subf %55, %67 : vector<8x32xf32>
    %cst_30 = arith.constant 9.99999974E-6 : f32
    %69 = vector.broadcast %cst_30 : f32 to vector<8x1xf32>
    %70 = arith.addf %66, %69 : vector<8x1xf32>
    %71 = math.rsqrt %70 : vector<8x1xf32>
    %72 = vector.broadcast %71 : vector<8x1xf32> to vector<8x32xf32>
    %73 = arith.mulf %68, %72 : vector<8x32xf32>
    %74 = vector.broadcast %5 : vector<1x32xf32> to vector<8x32xf32>
    %75 = arith.mulf %73, %74 : vector<8x32xf32>
    %76 = vector.broadcast %6 : vector<1x32xf32> to vector<8x32xf32>
    %77 = arith.addf %75, %76 : vector<8x32xf32>
    %78 = arith.truncf %77 : vector<8x32xf32> to vector<8x32xbf16>
    %c0_31 = arith.constant 0 : index
    %c0_32 = arith.constant 0 : index
    %79 = vector.load %arg8[%c0_31, %c0_32] : memref<32x128xbf16, #tpu.memory_space<vmem>>, vector<32x128xbf16>
    %cst_33 = arith.constant dense<0.000000e+00> : vector<8x128xf32>
    %80 = tpu.matmul %78, %79, %cst_33 {dimension_numbers = #tpu.dot_dimension_numbers<[1], [0], [0], [1], [0, 0, 1, 1], [], []>} : vector<8x32xbf16>, vector<32x128xbf16>, vector<8x128xf32> -> vector<8x128xf32>
    %c0_34 = arith.constant 0 : index
    %c0_35 = arith.constant 0 : index
    %81 = vector.load %arg11[%c0_34, %c0_35] : memref<1x128xf32, #tpu.memory_space<vmem>>, vector<1x128xf32>
    %82 = vector.broadcast %81 : vector<1x128xf32> to vector<8x128xf32>
    %83 = arith.addf %80, %82 : vector<8x128xf32>
    %c0_36 = arith.constant 0 : index
    %c0_37 = arith.constant 0 : index
    %84 = vector.load %arg12[%c0_36, %c0_37] : memref<8x128xf32, #tpu.memory_space<vmem>>, vector<8x128xf32>
    tpu.vector_store %arg12[%c0_36, %c0_37], %83 {strides = array<i32>} : memref<8x128xf32, #tpu.memory_space<vmem>>, vector<8x128xf32>,
    return
  }
  func.func @transform_0(%arg0: i32) -> (i32, i32) {
    %c0_i32 = arith.constant 0 : i32
    %c0_i32_0 = arith.constant 0 : i32
    return %arg0, %c0_i32 : i32, i32
  }
  func.func @transform_1(%arg0: i32) -> (i32, i32) {
    %c0_i32 = arith.constant 0 : i32
    %c0_i32_0 = arith.constant 0 : i32
    %c0_i32_1 = arith.constant 0 : i32
    return %c0_i32, %c0_i32_0 : i32, i32
  }
  func.func @transform_2(%arg0: i32) -> (i32, i32) {
    %c0_i32 = arith.constant 0 : i32
    %c0_i32_0 = arith.constant 0 : i32
    %c0_i32_1 = arith.constant 0 : i32
    return %c0_i32, %c0_i32_0 : i32, i32
  }
  func.func @transform_3(%arg0: i32) -> (i32, i32) {
    %c0_i32 = arith.constant 0 : i32
    %c0_i32_0 = arith.constant 0 : i32
    %c0_i32_1 = arith.constant 0 : i32
    return %c0_i32, %c0_i32_0 : i32, i32
  }
  func.func @transform_4(%arg0: i32) -> (i32, i32) {
    %c0_i32 = arith.constant 0 : i32
    %c0_i32_0 = arith.constant 0 : i32
    %c0_i32_1 = arith.constant 0 : i32
    return %c0_i32, %c0_i32_0 : i32, i32
  }
  func.func @transform_5(%arg0: i32) -> (i32, i32) {
    %c0_i32 = arith.constant 0 : i32
    %c0_i32_0 = arith.constant 0 : i32
    %c0_i32_1 = arith.constant 0 : i32
    return %c0_i32, %c0_i32_0 : i32, i32
  }
  func.func @transform_6(%arg0: i32) -> (i32, i32) {
    %c0_i32 = arith.constant 0 : i32
    %c0_i32_0 = arith.constant 0 : i32
    %c0_i32_1 = arith.constant 0 : i32
    return %c0_i32, %c0_i32_0 : i32, i32
  }
  func.func @transform_7(%arg0: i32) -> (i32, i32) {
    %c0_i32 = arith.constant 0 : i32
    %c0_i32_0 = arith.constant 0 : i32
    %c0_i32_1 = arith.constant 0 : i32
    return %c0_i32, %c0_i32_0 : i32, i32
  }
  func.func @transform_8(%arg0: i32) -> (i32, i32) {
    %c0_i32 = arith.constant 0 : i32
    %c0_i32_0 = arith.constant 0 : i32
    %c0_i32_1 = arith.constant 0 : i32
    return %c0_i32, %c0_i32_0 : i32, i32
  }
  func.func @transform_9(%arg0: i32) -> (i32, i32) {
    %c0_i32 = arith.constant 0 : i32
    %c0_i32_0 = arith.constant 0 : i32
    %c0_i32_1 = arith.constant 0 : i32
    return %c0_i32, %c0_i32_0 : i32, i32
  }
  func.func @transform_10(%arg0: i32) -> (i32, i32) {
    %c0_i32 = arith.constant 0 : i32
    %c0_i32_0 = arith.constant 0 : i32
    %c0_i32_1 = arith.constant 0 : i32
    return %c0_i32, %c0_i32_0 : i32, i32
  }
  func.func @transform_11(%arg0: i32) -> (i32, i32) {
    %c0_i32 = arith.constant 0 : i32
    %c0_i32_0 = arith.constant 0 : i32
    return %arg0, %c0_i32 : i32, i32
  }
}

module attributes {stable_mosaic.version = 11 : i64} {
  func.func @qformer_kernel(%arg0: i32, %arg1: memref<16x32xbf16, #tpu.memory_space<vmem>>, %arg2: memref<4x32xbf16, #tpu.memory_space<vmem>>, %arg3: memref<32x32xbf16, #tpu.memory_space<vmem>>, %arg4: memref<32x32xbf16, #tpu.memory_space<vmem>>, %arg5: memref<32x32xbf16, #tpu.memory_space<vmem>>, %arg6: memref<32x96xbf16, #tpu.memory_space<vmem>>, %arg7: memref<96x32xbf16, #tpu.memory_space<vmem>>, %arg8: memref<32x128xbf16, #tpu.memory_space<vmem>>, %arg9: memref<8x32xf32, #tpu.memory_space<vmem>>, %arg10: memref<1x96xf32, #tpu.memory_space<vmem>>, %arg11: memref<1x128xf32, #tpu.memory_space<vmem>>, %arg12: memref<8x128xf32, #tpu.memory_space<vmem>>) attributes {dimension_semantics = [#tpu.dimension_semantics<parallel>], iteration_bounds = array<i64: 1>, scalar_prefetch = 0 : i64, scratch_operands = 0 : i64, tpu.core_type = #tpu.core_type<tc>, window_params = [{transform_indices = @transform_0, window_bounds = array<i64: 16, 32>}, {pipeline_mode = #tpu.pipeline_mode<synchronous>, transform_indices = @transform_1, window_bounds = array<i64: 4, 32>}, {pipeline_mode = #tpu.pipeline_mode<synchronous>, transform_indices = @transform_2, window_bounds = array<i64: 32, 32>}, {pipeline_mode = #tpu.pipeline_mode<synchronous>, transform_indices = @transform_3, window_bounds = array<i64: 32, 32>}, {pipeline_mode = #tpu.pipeline_mode<synchronous>, transform_indices = @transform_4, window_bounds = array<i64: 32, 32>}, {pipeline_mode = #tpu.pipeline_mode<synchronous>, transform_indices = @transform_5, window_bounds = array<i64: 32, 96>}, {pipeline_mode = #tpu.pipeline_mode<synchronous>, transform_indices = @transform_6, window_bounds = array<i64: 96, 32>}, {pipeline_mode = #tpu.pipeline_mode<synchronous>, transform_indices = @transform_7, window_bounds = array<i64: 32, 128>}, {pipeline_mode = #tpu.pipeline_mode<synchronous>, transform_indices = @transform_8, window_bounds = array<i64: 8, 32>}, {pipeline_mode = #tpu.pipeline_mode<synchronous>, transform_indices = @transform_9, window_bounds = array<i64: 1, 96>}, {pipeline_mode = #tpu.pipeline_mode<synchronous>, transform_indices = @transform_10, window_bounds = array<i64: 1, 128>}, {transform_indices = @transform_11, window_bounds = array<i64: 8, 128>}]} {
    %c0 = arith.constant 0 : index
    %c0_0 = arith.constant 0 : index
    %0 = vector.load %arg9[%c0, %c0_0] : memref<8x32xf32, #tpu.memory_space<vmem>>, vector<8x32xf32>
    %1 = vector.extract_strided_slice %0 {offsets = [0, 0], sizes = [1, 32], strides = [1, 1]} : vector<8x32xf32> to vector<1x32xf32>
    %2 = vector.extract_strided_slice %0 {offsets = [1, 0], sizes = [1, 32], strides = [1, 1]} : vector<8x32xf32> to vector<1x32xf32>
    %3 = vector.extract_strided_slice %0 {offsets = [2, 0], sizes = [1, 32], strides = [1, 1]} : vector<8x32xf32> to vector<1x32xf32>
    %4 = vector.extract_strided_slice %0 {offsets = [3, 0], sizes = [1, 32], strides = [1, 1]} : vector<8x32xf32> to vector<1x32xf32>
    %5 = vector.extract_strided_slice %0 {offsets = [4, 0], sizes = [1, 32], strides = [1, 1]} : vector<8x32xf32> to vector<1x32xf32>
    %6 = vector.extract_strided_slice %0 {offsets = [5, 0], sizes = [1, 32], strides = [1, 1]} : vector<8x32xf32> to vector<1x32xf32>
    %c0_1 = arith.constant 0 : index
    %c0_2 = arith.constant 0 : index
    %7 = vector.load %arg1[%c0_1, %c0_2] : memref<16x32xbf16, #tpu.memory_space<vmem>>, vector<16x32xbf16>
    %c0_3 = arith.constant 0 : index
    %c0_4 = arith.constant 0 : index
    %8 = vector.load %arg2[%c0_3, %c0_4] : memref<4x32xbf16, #tpu.memory_space<vmem>>, vector<4x32xbf16>
    %c0_5 = arith.constant 0 : index
    %c0_6 = arith.constant 0 : index
    %9 = vector.load %arg3[%c0_5, %c0_6] : memref<32x32xbf16, #tpu.memory_space<vmem>>, vector<32x32xbf16>
    %cst = arith.constant dense<0.000000e+00> : vector<16x32xf32>
    %10 = tpu.matmul %7, %9, %cst {dimension_numbers = #tpu.dot_dimension_numbers<[1], [0], [0], [1], [0, 0, 1, 1], [], []>} : vector<16x32xbf16>, vector<32x32xbf16>, vector<16x32xf32> -> vector<16x32xf32>
    %11 = vector.broadcast %1 : vector<1x32xf32> to vector<16x32xf32>
    %12 = arith.addf %10, %11 : vector<16x32xf32>
    %c0_7 = arith.constant 0 : index
    %c0_8 = arith.constant 0 : index
    %13 = vector.load %arg4[%c0_7, %c0_8] : memref<32x32xbf16, #tpu.memory_space<vmem>>, vector<32x32xbf16>
    %cst_9 = arith.constant dense<0.000000e+00> : vector<16x32xf32>
    %14 = tpu.matmul %7, %13, %cst_9 {dimension_numbers = #tpu.dot_dimension_numbers<[1], [0], [0], [1], [0, 0, 1, 1], [], []>} : vector<16x32xbf16>, vector<32x32xbf16>, vector<16x32xf32> -> vector<16x32xf32>
    %15 = vector.broadcast %2 : vector<1x32xf32> to vector<16x32xf32>
    %16 = arith.addf %14, %15 : vector<16x32xf32>
    %17 = arith.truncf %12 : vector<16x32xf32> to vector<16x32xbf16>
    %18 = vector.shape_cast %17 : vector<16x32xbf16> to vector<2x8x32xbf16>
    %19 = arith.truncf %16 : vector<16x32xf32> to vector<16x32xbf16>
    %20 = vector.shape_cast %19 : vector<16x32xbf16> to vector<2x8x32xbf16>
    %21 = vector.shape_cast %8 : vector<4x32xbf16> to vector<1x4x32xbf16>
    %22 = vector.broadcast %21 : vector<1x4x32xbf16> to vector<2x4x32xbf16>
    "tpu.trace_start"() <{level = 10 : i32, message = "bqh,bsh->bqs"}> : () -> ()
    %cst_10 = arith.constant dense<0.000000e+00> : vector<2x4x8xf32>
    %23 = tpu.matmul %22, %18, %cst_10 {dimension_numbers = #tpu.dot_dimension_numbers<[2], [2], [1], [1], [0, 0, 0, 1, 1, 1], [0], [0]>} : vector<2x4x32xbf16>, vector<2x8x32xbf16>, vector<2x4x8xf32> -> vector<2x4x8xf32>
    "tpu.trace_stop"() : () -> ()
    %cst_11 = arith.constant dense<0xFF800000> : vector<2x4xf32>
    %24 = vector.multi_reduction <maximumf>, %23, %cst_11 [2] : vector<2x4x8xf32> to vector<2x4xf32>
    %25 = vector.shape_cast %24 : vector<2x4xf32> to vector<2x4x1xf32>
    %26 = vector.broadcast %25 : vector<2x4x1xf32> to vector<2x4x8xf32>
    %27 = arith.subf %23, %26 : vector<2x4x8xf32>
    %28 = math.exp %27 : vector<2x4x8xf32>
    %cst_12 = arith.constant dense<0.000000e+00> : vector<2x4xf32>
    %29 = vector.multi_reduction <add>, %28, %cst_12 [2] : vector<2x4x8xf32> to vector<2x4xf32>
    %30 = vector.shape_cast %29 : vector<2x4xf32> to vector<2x4x1xf32>
    %31 = tpu.reciprocal %30 {approx = true} : vector<2x4x1xf32> -> vector<2x4x1xf32>
    %32 = vector.broadcast %31 : vector<2x4x1xf32> to vector<2x4x8xf32>
    %33 = arith.mulf %28, %32 : vector<2x4x8xf32>
    %34 = arith.truncf %33 : vector<2x4x8xf32> to vector<2x4x8xbf16>
    "tpu.trace_start"() <{level = 10 : i32, message = "bqs,bsh->bqh"}> : () -> ()
    %cst_13 = arith.constant dense<0.000000e+00> : vector<2x4x32xf32>
    %35 = tpu.matmul %34, %20, %cst_13 {dimension_numbers = #tpu.dot_dimension_numbers<[2], [1], [1], [2], [0, 0, 0, 1, 1, 2], [0], [0]>} : vector<2x4x8xbf16>, vector<2x8x32xbf16>, vector<2x4x32xf32> -> vector<2x4x32xf32>
    "tpu.trace_stop"() : () -> ()
    %36 = vector.shape_cast %35 : vector<2x4x32xf32> to vector<8x32xf32>
    %37 = arith.truncf %36 : vector<8x32xf32> to vector<8x32xbf16>
    %c0_14 = arith.constant 0 : index
    %c0_15 = arith.constant 0 : index
    %38 = vector.load %arg5[%c0_14, %c0_15] : memref<32x32xbf16, #tpu.memory_space<vmem>>, vector<32x32xbf16>
    %cst_16 = arith.constant dense<0.000000e+00> : vector<8x32xf32>
    %39 = tpu.matmul %37, %38, %cst_16 {dimension_numbers = #tpu.dot_dimension_numbers<[1], [0], [0], [1], [0, 0, 1, 1], [], []>} : vector<8x32xbf16>, vector<32x32xbf16>, vector<8x32xf32> -> vector<8x32xf32>
    %40 = vector.broadcast %3 : vector<1x32xf32> to vector<8x32xf32>
    %41 = arith.addf %39, %40 : vector<8x32xf32>
    %42 = arith.truncf %41 : vector<8x32xf32> to vector<8x32xbf16>
    %c0_17 = arith.constant 0 : index
    %c0_18 = arith.constant 0 : index
    %43 = vector.load %arg6[%c0_17, %c0_18] : memref<32x96xbf16, #tpu.memory_space<vmem>>, vector<32x96xbf16>
    %cst_19 = arith.constant dense<0.000000e+00> : vector<8x96xf32>
    %44 = tpu.matmul %42, %43, %cst_19 {dimension_numbers = #tpu.dot_dimension_numbers<[1], [0], [0], [1], [0, 0, 1, 1], [], []>} : vector<8x32xbf16>, vector<32x96xbf16>, vector<8x96xf32> -> vector<8x96xf32>
    %c0_20 = arith.constant 0 : index
    %c0_21 = arith.constant 0 : index
    %45 = vector.load %arg10[%c0_20, %c0_21] : memref<1x96xf32, #tpu.memory_space<vmem>>, vector<1x96xf32>
    %46 = vector.broadcast %45 : vector<1x96xf32> to vector<8x96xf32>
    %47 = arith.addf %44, %46 : vector<8x96xf32>
    %cst_22 = arith.constant 0.000000e+00 : f32
    %48 = vector.broadcast %cst_22 : f32 to vector<8x96xf32>
    %49 = arith.maximumf %47, %48 : vector<8x96xf32>
    %50 = arith.truncf %49 : vector<8x96xf32> to vector<8x96xbf16>
    %c0_23 = arith.constant 0 : index
    %c0_24 = arith.constant 0 : index
    %51 = vector.load %arg7[%c0_23, %c0_24] : memref<96x32xbf16, #tpu.memory_space<vmem>>, vector<96x32xbf16>
    %cst_25 = arith.constant dense<0.000000e+00> : vector<8x32xf32>
    %52 = tpu.matmul %50, %51, %cst_25 {dimension_numbers = #tpu.dot_dimension_numbers<[1], [0], [0], [1], [0, 0, 1, 1], [], []>} : vector<8x96xbf16>, vector<96x32xbf16>, vector<8x32xf32> -> vector<8x32xf32>
    %53 = vector.broadcast %4 : vector<1x32xf32> to vector<8x32xf32>
    %54 = arith.addf %52, %53 : vector<8x32xf32>
    %55 = arith.addf %54, %41 : vector<8x32xf32>
    %cst_26 = arith.constant dense<0.000000e+00> : vector<8xf32>
    %56 = vector.multi_reduction <add>, %55, %cst_26 [1] : vector<8x32xf32> to vector<8xf32>
    %57 = vector.shape_cast %56 : vector<8xf32> to vector<8x1xf32>
    %cst_27 = arith.constant 3.200000e+01 : f32
    %58 = vector.broadcast %cst_27 : f32 to vector<8x1xf32>
    %59 = arith.divf %57, %58 : vector<8x1xf32>
    %60 = vector.broadcast %59 : vector<8x1xf32> to vector<8x32xf32>
    %61 = arith.subf %55, %60 : vector<8x32xf32>
    %62 = arith.mulf %61, %61 : vector<8x32xf32>
    %cst_28 = arith.constant dense<0.000000e+00> : vector<8xf32>
    %63 = vector.multi_reduction <add>, %62, %cst_28 [1] : vector<8x32xf32> to vector<8xf32>
    %64 = vector.shape_cast %63 : vector<8xf32> to vector<8x1xf32>
    %cst_29 = arith.constant 3.200000e+01 : f32
    %65 = vector.broadcast %cst_29 : f32 to vector<8x1xf32>
    %66 = arith.divf %64, %65 : vector<8x1xf32>
    %67 = vector.broadcast %59 : vector<8x1xf32> to vector<8x32xf32>
    %68 = arith.subf %55, %67 : vector<8x32xf32>
    %cst_30 = arith.constant 9.99999974E-6 : f32
    %69 = vector.broadcast %cst_30 : f32 to vector<8x1xf32>
    %70 = arith.addf %66, %69 : vector<8x1xf32>
    %71 = math.rsqrt %70 : vector<8x1xf32>
    %72 = vector.broadcast %71 : vector<8x1xf32> to vector<8x32xf32>
    %73 = arith.mulf %68, %72 : vector<8x32xf32>
    %74 = vector.broadcast %5 : vector<1x32xf32> to vector<8x32xf32>
    %75 = arith.mulf %73, %74 : vector<8x32xf32>
    %76 = vector.broadcast %6 : vector<1x32xf32> to vector<8x32xf32>
    %77 = arith.addf %75, %76 : vector<8x32xf32>
    %78 = arith.truncf %77 : vector<8x32xf32> to vector<8x32xbf16>
    %c0_31 = arith.constant 0 : index
    %c0_32 = arith.constant 0 : index
    %79 = vector.load %arg8[%c0_31, %c0_32] : memref<32x128xbf16, #tpu.memory_space<vmem>>, vector<32x128xbf16>
    %cst_33 = arith.constant dense<0.000000e+00> : vector<8x128xf32>
    %80 = tpu.matmul %78, %79, %cst_33 {dimension_numbers = #tpu.dot_dimension_numbers<[1], [0], [0], [1], [0, 0, 1, 1], [], []>} : vector<8x32xbf16>, vector<32x128xbf16>, vector<8x128xf32> -> vector<8x128xf32>
    %c0_34 = arith.constant 0 : index
    %c0_35 = arith.constant 0 : index
    %81 = vector.load %arg11[%c0_34, %c0_35] : memref<1x128xf32, #tpu.memory_space<vmem>>, vector<1x128xf32>
    %82 = vector.broadcast %81 : vector<1x128xf32> to vector<8x128xf32>
    %83 = arith.addf %80, %82 : vector<8x128xf32>
    %c0_36 = arith.constant 0 : index
    %c0_37 = arith.constant 0 : index
    %84 = vector.load %arg12[%c0_36, %c0_37] : memref<8x128xf32, #tpu.memory_space<vmem>>, vector<8x128xf32>
    tpu.vector_store %arg12[%c0_36, %c0_37], %83 {strides = array<i32>} : memref<8x128xf32, #tpu.memory_space<vmem>>, vector<8x128xf32>,
    return
  }
  func.func @transform_0(%arg0: i32) -> (i32, i32) {
    %c0_i32 = arith.constant 0 : i32
    %c0_i32_0 = arith.constant 0 : i32
    return %arg0, %c0_i32 : i32, i32
  }
  func.func @transform_1(%arg0: i32) -> (i32, i32) {
    %c0_i32 = arith.constant 0 : i32
    %c0_i32_0 = arith.constant 0 : i32
    %c0_i32_1 = arith.constant 0 : i32
    return %c0_i32, %c0_i32_0 : i32, i32
  }
  func.func @transform_2(%arg0: i32) -> (i32, i32) {
    %c0_i32 = arith.constant 0 : i32
    %c0_i32_0 = arith.constant 0 : i32
    %c0_i32_1 = arith.constant 0 : i32
    return %c0_i32, %c0_i32_0 : i32, i32
  }
  func.func @transform_3(%arg0: i32) -> (i32, i32) {
    %c0_i32 = arith.constant 0 : i32
    %c0_i32_0 = arith.constant 0 : i32
    %c0_i32_1 = arith.constant 0 : i32
    return %c0_i32, %c0_i32_0 : i32, i32
  }
  func.func @transform_4(%arg0: i32) -> (i32, i32) {
    %c0_i32 = arith.constant 0 : i32
    %c0_i32_0 = arith.constant 0 : i32
    %c0_i32_1 = arith.constant 0 : i32
    return %c0_i32, %c0_i32_0 : i32, i32
  }
  func.func @transform_5(%arg0: i32) -> (i32, i32) {
    %c0_i32 = arith.constant 0 : i32
    %c0_i32_0 = arith.constant 0 : i32
    %c0_i32_1 = arith.constant 0 : i32
    return %c0_i32, %c0_i32_0 : i32, i32
  }
  func.func @transform_6(%arg0: i32) -> (i32, i32) {
    %c0_i32 = arith.constant 0 : i32
    %c0_i32_0 = arith.constant 0 : i32
    %c0_i32_1 = arith.constant 0 : i32
    return %c0_i32, %c0_i32_0 : i32, i32
  }
  func.func @transform_7(%arg0: i32) -> (i32, i32) {
    %c0_i32 = arith.constant 0 : i32
    %c0_i32_0 = arith.constant 0 : i32
    %c0_i32_1 = arith.constant 0 : i32
    return %c0_i32, %c0_i32_0 : i32, i32
  }
  func.func @transform_8(%arg0: i32) -> (i32, i32) {
    %c0_i32 = arith.constant 0 : i32
    %c0_i32_0 = arith.constant 0 : i32
    %c0_i32_1 = arith.constant 0 : i32
    return %c0_i32, %c0_i32_0 : i32, i32
  }
  func.func @transform_9(%arg0: i32) -> (i32, i32) {
    %c0_i32 = arith.constant 0 : i32
    %c0_i32_0 = arith.constant 0 : i32
    %c0_i32_1 = arith.constant 0 : i32
    return %c0_i32, %c0_i32_0 : i32, i32
  }
  func.func @transform_10(%arg0: i32) -> (i32, i32) {
    %c0_i32 = arith.constant 0 : i32
    %c0_i32_0 = arith.constant 0 : i32
    %c0_i32_1 = arith.constant 0 : i32
    return %c0_i32, %c0_i32_0 : i32, i32
  }
  func.func @transform_11(%arg0: i32) -> (i32, i32) {
    %c0_i32 = arith.constant 0 : i32
    %c0_i32_0 = arith.constant 0 : i32
    return %arg0, %c0_i32 : i32, i32
  }
}

</mosaic_0001>

<bundles_post_ra>
// kernel: tpu_custom_call.1
= control target key start
LH: loop header
LB: loop body
LE: loop exit
PB: predicated region body
PF: predicated region fallthrough
CT: control target
= control target key end

     0   :  { %16 = vsyncpa [#allocation3], 0  ;;  %s1199_s0 = inlined_call_operand.hbm [shape: bf16[16,32], index: 0, kind: input, shape index: {}]   ;;  %s1200_s1 = inlined_call_operand.vmem [shape: bf16[4,32], index: 1, kind: input, shape index: {}]   ;;  %s1201_s2 = inlined_call_operand.vmem [shape: bf16[32,32], index: 2, kind: input, shape index: {}]   ;;  %s1202_s3 = inlined_call_operand.vmem [shape: bf16[32,32], index: 3, kind: input, shape index: {}]   ;;  %s1203_s4 = inlined_call_operand.vmem [shape: bf16[32,32], index: 4, kind: input, shape index: {}]   ;;  %s1204_s5 = inlined_call_operand.vmem [shape: bf16[32,96], index: 5, kind: input, shape index: {}]   ;;  %s1205_s6 = inlined_call_operand.vmem [shape: bf16[96,32], index: 6, kind: input, shape index: {}]   ;;  %s1206_s7 = inlined_call_operand.vmem [shape: bf16[32,128], index: 7, kind: input, shape index: {}]   ;;  %s1207_s8 = inlined_call_operand.vmem [shape: f32[8,32], index: 8, kind: input, shape index: {}]   ;;  %s1208_s9 = inlined_call_operand.vmem [shape: f32[1,96], index: 9, kind: input, shape index: {}]   ;;  %s1209_s10 = inlined_call_operand.vmem [shape: f32[1,128], index: 10, kind: input, shape index: {}]   ;;  %s1210_s11 = inlined_call_operand.hbm [shape: f32[8,128], index: 11, kind: output, shape index: {}]  }
   0x1   :  { %17 = vsyncpa [#allocation4], 0  ;;  %s978_s17 = smov [#allocation2]   ;;  %s930_s21 = scalar_lea.hbm %s1199_s0, 128 }
   0x2   :  { %s23_s18 = sshll.u32 %s978_s17, 4  ;;  %p931_p0 = scmp.ne.s32.totalorder %s1199_s0, %s930_s21  ;;  %s24_s18 = int_to_ptr.vmem [resolvable:$true] %s23_s18 }
   0x3   :  { %p934_p1 = scmp.lt.u32.totalorder %s930_s21, %s1199_s0 }
   0x5   :  { %p936_p2 = pnand %p934_p1, %p931_p0 }
   0x7   :  { %939 = shalt.err (!%p936_p2)
}
   0x8   :  { %s940_s26 = scalar_lea.vmem %s24_s18, 128  ;;  %p945_p4 = scmp.lt.s32.totalorder %s24_s18, %s24_s18 }
   0x9   :  { %p941_p3 = scmp.ne.s32.totalorder %s24_s18, %s940_s26  ;;  %p946_p5 = scmp.lt.s32.totalorder %s940_s26, %s940_s26 }
   0xb   :  { %p947_p6 = por %p946_p5, %p945_p4 }
   0xd   :  { %p948_p7 = pnand %p947_p6, %p941_p3 }
   0xf   :  { %951 = shalt.err (!%p948_p7)
}
  0x10   :  { %s979_s27 = smov 64   ;;  %s980_s28 = smov 4  }
  0x11   :  { %29 = dma.hbm_to_vmem [thread:$0]  %s1199_s0, 128, %s24_s18, [#allocation3], %s979_s27, %s979_s27, %s980_s28  }
  0x12   :  { %974 = dma.done.wait [#allocation3], 128  }
  0x13   :  { %975 = vsyncadd [#allocation3], 4294967168  ;;  %v981_v0 = vmov 0.0   ;;  %vm982_vm0 = vmmov 0   ;;  %v903_v1 = vld [vmem:[%s1201_s2] sm:$0xff]   ;;  %v904_v2 = vld [vmem:[%s1201_s2 + $0x8] sm:$0xff]   ;;  %v62_v6 = vlaneseq }
  0x14   :  { %817 = vmatprep.subr.bf16.mxu1 %v981_v0  ;;  %821 = vmatprep.mubr.msk.bf16.mxu1 %vm982_vm0, %v981_v0  ;;  %v905_v3 = vld [vmem:[#allocation2] sm:$0xff]   ;;  %vm83_vm1 = vcmask 261120   ;;  %v907_v5 = vld [vmem:[%s1202_s3 + $0x8] sm:$0xff]   ;;  %vm319_vm2 = vcmask 1043456   ;;  %vm290_vm3 = vcmask 60416   ;;  %vm315_vm4 = vcmask 64512  }
  0x15   :  { %833 = vmatprep.subr.bf16.mxu0 %v981_v0  ;;  %835 = vmatprep.mubr.msk.bf16.mxu0 %vm982_vm0, %v981_v0  ;;  %v906_v4 = vld [vmem:[%s1202_s3] sm:$0xff]   ;;  %v1084_v7 = vshrl.u32 %v62_v6, 7  ;;  %v909_v63 = vld [vmem:[%s1203_s4 + $0x8] sm:$0xff]   ;;  %vm598_vm5 = vcmask 785408   ;;  %s983_s19 = smov [#allocation5]  }
  0x16   :  { %818 = vmatpush3.bf16.msra.mxu1 %v903_v1  ;;  %v1090_v9 = vld [vmem:[%s1207_s8] sm:$0xff] }
  0x17   :  { %819 = vmatprep.subr.bf16.mxu1 %v981_v0  ;;  %v64_v8 = vsub.s32 0, %v1084_v7  ;;  %v134_v14 = vsub.s32 1, %v1084_v7  ;;  %v57_v26 = vld [vmem:[%s1200_s1] sm:$0x3]  ;;  %s741_s1 = sshll.u32 %s983_s19, 4  ;;  %s742_s1 = int_to_ptr.vmem [resolvable:$true] %s741_s1 }
  0x18   :  { %v908_v62 = vld [vmem:[%s1203_s4] sm:$0xff]   ;;  %s952_s20 = scalar_lea.vmem %s742_s1, 128  ;;  %p957_p9 = scmp.lt.s32.totalorder %s742_s1, %s742_s1 }
  0x19   :  { %v65_v10 = vrot.slane %v1090_v9, %v64_v8  ;;  %v135_v21 = vrot.slane %v1090_v9, %v134_v14  ;;  %v910_v1 = vld [vmem:[%s1204_s5] sm:$0xff]   ;;  %v911_v14 = vld [vmem:[%s1204_s5 + $0x8] sm:$0xff]   ;;  %p953_p8 = scmp.ne.s32.totalorder %s742_s1, %s952_s20  ;;  %p958_p10 = scmp.lt.s32.totalorder %s952_s20, %s952_s20 }
  0x1a   :  { %820 = vmatpush3.bf16.msra.mxu1 %v904_v2 }
  0x1b   :  { %825 = vmatprep.subr.bf16.mxu1 %v981_v0  ;;  %p959_p11 = por %p958_p10, %p957_p9 }
  0x1d   :  { %822 = vmatmul.mubr.msk.bf16.vlgmr.msra.gmra.mrb[0].mxu1 %vm83_vm1, %v905_v3  ;;  %p960_p12 = pnand %p959_p11, %p953_p8 }
  0x1e   :  { %826 = vmatpush3.bf16.msra.mxu1 %v906_v4  ;;  %829 = vmatprep.mubr.msk.bf16.mxu1 %vm982_vm0, %v981_v0 }
  0x1f   :  { %827 = vmatprep.subr.bf16.mxu1 %v981_v0 }
  0x22   :  { %828 = vmatpush3.bf16.msra.mxu1 %v907_v5 }
  0x23   :  { %839 = vmatprep.subr.bf16.mxu1 %v981_v0 }
  0x25   :  { %830 = vmatmul.mubr.msk.bf16.vlgmr.msra.gmra.mrb[4].mxu1 %vm83_vm1, %v905_v3 }
  0x26   :  { %841 = vmatprep.mubr.msk.bf16.mxu1 %vm982_vm0, %v981_v0 }
  0xf0   :  { %v121_v11 = vpop.f32.mrb[0].mxu1 }
  0xf1   :  { %v122_v12 = vadd.f32 %v121_v11, %v65_v10  ;;  %v823_v13 = vpop.f32.mrb[1].mxu1 }
  0xf2   :  { %v124_v15 = vpop.f32.mrb[2].mxu1 }
  0xf3   :  { %v783_v16 = vpack.c.bf16 %v122_v12, %v122_v12  ;;  %v125_v17 = vadd.f32 %v124_v15, %v65_v10  ;;  %v824_v18 = vpop.f32.mrb[3].mxu1  ;;  %v912_v15 = vld [vmem:[%s1205_s6] sm:$0xff]  }
  0xf4   :  { %v915_v18 = vld [vmem:[%s1205_s6 + $0x18] sm:$0xff]  }
  0xf5   :  { %v784_v19 = vpack.c.bf16 %v125_v17, %v125_v17  ;;  %v205_v20 = vsel %vm83_vm1, %v783_v16, 0  ;;  %v913_v16 = vld [vmem:[%s1205_s6 + $0x8] sm:$0xff]   ;;  %v914_v17 = vld [vmem:[%s1205_s6 + $0x10] sm:$0xff]  }
  0xf6   :  { %834 = vmatpush3.bf16.xpose.msra.mxu0 %v205_v20 }
  0xf7   :  { %v248_v22 = vsel %vm83_vm1, %v784_v19, 0  ;;  %845 = vmatprep.subr.bf16.mxu0 %v981_v0  ;;  %v420_v19 = vsub.s32 2, %v1084_v7 }
  0xf8   :  { %840 = vmatpush3.bf16.xpose.msra.mxu1 %v248_v22  ;;  %v182_v23 = vpop.f32.mrb[4].mxu1 }
  0xf9   :  { %v183_v24 = vadd.f32 %v182_v23, %v135_v21  ;;  %v831_v25 = vpop.f32.mrb[5].mxu1  ;;  %851 = vmatprep.subr.bf16.mxu1 %v981_v0  ;;  %v421_v20 = vrot.slane %v1090_v9, %v420_v19 }
  0xfa   :  { %v185_v27 = vpop.f32.mrb[6].mxu1 }
  0xfb   :  { %v785_v28 = vpack.c.bf16 %v183_v24, %v183_v24  ;;  %v186_v29 = vadd.f32 %v185_v27, %v135_v21  ;;  %v832_v30 = vpop.f32.mrb[7].mxu1  ;;  %v916_v27 = vld [vmem:[%s1205_s6 + $0x20] sm:$0xff]  }
  0xfd   :  { %836 = vmatmul.mubr.msk.bf16.vlgmr.msra.gmra.mrb[0].mxu0 %vm83_vm1, %v57_v26  ;;  %v321_v31 = vsel %vm319_vm2, %v785_v28, 0  ;;  %v786_v32 = vpack.c.bf16 %v186_v29, %v186_v29  ;;  %v917_v28 = vld [vmem:[%s1205_s6 + $0x28] sm:$0xff]   ;;  %v768_v29 = vld [vmem:[%s1208_s9] ss:$0 sm:$0xff] }
  0xfe   :  { %846 = vmatpush3.bf16.msra.mxu0 %v321_v31  ;;  %847 = vmatprep.mubr.msk.bf16.mxu0 %vm982_vm0, %v981_v0 }
  0xff   :  { %842 = vmatmul.mubr.msk.bf16.vlgmr.msra.gmra.mrb[8].mxu1 %vm83_vm1, %v57_v26  ;;  %v367_v33 = vsel %vm319_vm2, %v786_v32, 0  ;;  %857 = vmatprep.subr.bf16.mxu0 %v981_v0 }
 0x100   :  { %852 = vmatpush3.bf16.msra.mxu1 %v367_v33  ;;  %853 = vmatprep.mubr.msk.bf16.mxu1 %vm982_vm0, %v981_v0 }
 0x101   :  { %865 = vmatprep.subr.bf16.mxu1 %v981_v0 }
 0x1d0   :  { %v241_v34 = vpop.f32.mrb[0].mxu0 }
 0x1d1   :  { %v837_v35 = vpop.f32.mrb[1].mxu0  ;;  %v291_v36 = vsel %vm290_vm3, %v241_v34, -inf }
 0x1d2   :  { %v284_v37 = vpop.f32.mrb[8].mxu1  ;;  %292 = vmax.xlane.f32.xlu0 %v291_v36  ;;  %v244_v38 = vpop.f32.mrb[2].mxu0 }
 0x1d3   :  { %v838_v39 = vpop.f32.mrb[3].mxu0  ;;  %v843_v40 = vpop.f32.mrb[9].mxu1  ;;  %v294_v41 = vsel %vm290_vm3, %v284_v37, -inf }
 0x1d4   :  { %v287_v42 = vpop.f32.mrb[10].mxu1 }
 0x1d5   :  { %v844_v43 = vpop.f32.mrb[11].mxu1 }
 0x1d6   :  { %295 = vmax.xlane.f32.xlu0 %v294_v41 }
 0x25f   :  { %v293_v44 = vpop.xlane.xlu0 %292 }
 0x260   :  { %v297_v45 = vsub.f32 %v241_v34, %v293_v44 }
 0x262   :  { %v299_v46 = vmul.f32 1.442695, %v297_v45 }
 0x263   :  { %v296_v47 = vpop.xlane.xlu0 %295 }
 0x264   :  { %920 = vpow2.f32 %v299_v46  ;;  %v298_v48 = vsub.f32 %v284_v37, %v296_v47  ;;  %v560_v37 = vsub.s32 3, %v1084_v7 }
 0x266   :  { %v301_v49 = vmul.f32 1.442695, %v298_v48  ;;  %v561_v38 = vrot.slane %v1090_v9, %v560_v37 }
 0x268   :  { %922 = vpow2.f32 %v301_v49 }
 0x26e   :  { %v921_v50 = vpop.eup %920 }
 0x26f   :  { %v303_v51 = vsel %vm290_vm3, %v921_v50, 0.0 }
 0x270   :  { %304 = vadd.xlane.f32.xlu1 %v303_v51  ;;  %v918_v51 = vld [vmem:[%s1206_s7] sm:$0xff]  }
 0x272   :  { %v923_v52 = vpop.eup %922 }
 0x273   :  { %v306_v53 = vsel %vm290_vm3, %v923_v52, 0.0 }
 0x274   :  { %307 = vadd.xlane.f32.xlu1 %v306_v53 }
 0x2fd   :  { %v305_v54 = vpop.xlane.xlu1 %304 }
 0x2fe   :  { %924 = vrcp.f32 %v305_v54 }
 0x301   :  { %v308_v55 = vpop.xlane.xlu1 %307 }
 0x302   :  { %926 = vrcp.f32 %v308_v55 }
 0x308   :  { %v925_v56 = vpop.eup %924 }
 0x309   :  { %v311_v57 = vmul.f32 %v925_v56, %v921_v50  ;;  %v659_v56 = vsub.s32 4, %v1084_v7 }
 0x30b   :  { %v313_v58 = vpack.c.bf16 %v311_v57, %v311_v57  ;;  %v664_v57 = vsub.s32 5, %v1084_v7 }
 0x30c   :  { %v927_v59 = vpop.eup %926 }
 0x30d   :  { %v312_v60 = vmul.f32 %v927_v59, %v923_v52  ;;  %848 = vmatmul.mubr.msk.bf16.vlgmr.msra.gmra.mrb[4].mxu0 %vm315_vm4, %v313_v58  ;;  %v919_v52 = vld [vmem:[%s1206_s7 + $0x8] sm:$0xff]   ;;  %v660_v58 = vrot.slane %v1090_v9, %v659_v56 }
 0x30e   :  { %861 = vmatprep.mubr.msk.bf16.mxu0 %vm982_vm0, %v981_v0  ;;  %858 = vmatpush3.bf16.msra.mxu0 %v908_v62 }
 0x30f   :  { %v314_v61 = vpack.c.bf16 %v312_v60, %v312_v60  ;;  %859 = vmatprep.subr.bf16.mxu0 %v981_v0 }
 0x311   :  { %854 = vmatmul.mubr.msk.bf16.vlgmr.msra.gmra.mrb[12].mxu1 %vm315_vm4, %v314_v61  ;;  %v665_v61 = vrot.slane %v1090_v9, %v664_v57 }
 0x312   :  { %869 = vmatprep.mubr.msk.bf16.mxu1 %vm982_vm0, %v981_v0  ;;  %860 = vmatpush3.bf16.msra.mxu0 %v909_v63 }
 0x313   :  { %873 = vmatprep.subr.bf16.mxu0 %v981_v0  ;;  %866 = vmatpush3.bf16.msra.mxu1 %v910_v1  ;;  %v779_v1 = vld [vmem:[%s1209_s10] ss:$0 sm:$0xff] }
 0x314   :  { %867 = vmatprep.subr.bf16.mxu1 %v981_v0 }
 0x317   :  { %868 = vmatpush3.bf16.msra.mxu1 %v911_v14 }
 0x318   :  { %889 = vmatprep.subr.bf16.mxu1 %v981_v0 }
 0x3e0   :  { %v357_v2 = vpop.f32.mrb[4].mxu0 }
 0x3e1   :  { %v849_v3 = vpop.f32.mrb[5].mxu0 }
 0x3e2   :  { %v360_v4 = vpop.f32.mrb[6].mxu0 }
 0x3e3   :  { %v850_v5 = vpop.f32.mrb[7].mxu0 }
 0x3e4   :  { %v403_v6 = vpop.f32.mrb[12].mxu1 }
 0x3e5   :  { %v411_v8 = vcombine.low %v357_v2, %v403_v6  ;;  %v855_v10 = vpop.f32.mrb[13].mxu1 }
 0x3e6   :  { %v406_v11 = vpop.f32.mrb[14].mxu1 }
 0x3e7   :  { %v413_v12 = vpack.c.bf16 %v411_v8, %v411_v8  ;;  %v856_v13 = vpop.f32.mrb[15].mxu1 }
 0x3e9   :  { %862 = vmatmul.mubr.msk.bf16.vlgmr.msra.gmra.mrb[8].mxu0 %vm83_vm1, %v413_v12 }
 0x3ea   :  { %885 = vmatprep.mubr.msk.bf16.mxu0 %vm982_vm0, %v981_v0  ;;  %874 = vmatpush3.bf16.msra.mxu0 %v912_v15 }
 0x3eb   :  { %875 = vmatprep.subr.bf16.mxu0 %v981_v0 }
 0x3ee   :  { %876 = vmatpush3.bf16.msra.mxu0 %v913_v16 }
 0x3ef   :  { %877 = vmatprep.subr.bf16.mxu0 %v981_v0 }
 0x3f2   :  { %878 = vmatpush3.bf16.msra.mxu0 %v914_v17 }
 0x3f3   :  { %879 = vmatprep.subr.bf16.mxu0 %v981_v0 }
 0x3f6   :  { %880 = vmatpush3.bf16.msra.mxu0 %v915_v18 }
 0x3f7   :  { %881 = vmatprep.subr.bf16.mxu0 %v981_v0 }
 0x3fa   :  { %882 = vmatpush3.bf16.msra.mxu0 %v916_v27 }
 0x3fb   :  { %883 = vmatprep.subr.bf16.mxu0 %v981_v0 }
 0x3fe   :  { %884 = vmatpush3.bf16.msra.mxu0 %v917_v28 }
 0x4bc   :  { %v471_v21 = vpop.f32.mrb[8].mxu0 }
 0x4bd   :  { %v472_v22 = vadd.f32 %v471_v21, %v421_v20  ;;  %v863_v23 = vpop.f32.mrb[9].mxu0 }
 0x4be   :  { %v474_v24 = vpop.f32.mrb[10].mxu0 }
 0x4bf   :  { %v477_v25 = vpack.c.bf16 %v472_v22, %v472_v22  ;;  %v864_v26 = vpop.f32.mrb[11].mxu0 }
 0x4c1   :  { %870 = vmatmul.mubr.msk.bf16.vlgmr.msra.gmra.mrb[16].mxu1 %vm83_vm1, %v477_v25 }
 0x4c2   :  { %893 = vmatprep.mubr.msk.bf16.mxu1 %vm982_vm0, %v981_v0  ;;  %890 = vmatpush3.bf16.msra.mxu1 %v918_v51 }
 0x4c3   :  { %891 = vmatprep.subr.bf16.mxu1 %v981_v0 }
 0x4c6   :  { %892 = vmatpush3.bf16.msra.mxu1 %v919_v52 }
 0x594   :  { %v538_v30 = vpop.f32.mrb[16].mxu1 }
 0x595   :  { %v539_v31 = vadd.f32 %v768_v29, %v538_v30  ;;  %v871_v32 = vpop.f32.mrb[17].mxu1 }
 0x596   :  { %v541_v33 = vpop.f32.mrb[18].mxu1 }
 0x597   :  { %v544_v34 = vmax.f32 %v539_v31, 0.0  ;;  %v872_v35 = vpop.f32.mrb[19].mxu1 }
 0x599   :  { %v545_v36 = vpack.c.bf16 %v544_v34, %v544_v34 }
 0x59b   :  { %886 = vmatmul.mubr.msk.bf16.vlgmr.msra.gmra.mrb[12].mxu0 %vm598_vm5, %v545_v36 }
 0x66e   :  { %v636_v39 = vpop.f32.mrb[12].mxu0 }
 0x66f   :  { %v637_v40 = vadd.f32 %v636_v39, %v561_v38  ;;  %v887_v41 = vpop.f32.mrb[13].mxu0 }
 0x670   :  { %v639_v42 = vpop.f32.mrb[14].mxu0 }
 0x671   :  { %v888_v43 = vpop.f32.mrb[15].mxu0  ;;  %v642_v44 = vadd.f32 %v637_v40, %v472_v22 }
 0x673   :  { %v643_v45 = vsel %vm83_vm1, %v642_v44, 0.0 }
 0x674   :  { %644 = vadd.xlane.f32.xlu0 %v643_v45 }
 0x701   :  { %v645_v46 = vpop.xlane.xlu0 %644 }
 0x702   :  { %v647_v47 = vmul.f32 0.03125, %v645_v46 }
 0x704   :  { %v648_v48 = vsub.f32 %v642_v44, %v647_v47 }
 0x706   :  { %v649_v49 = vmul.f32 %v648_v48, %v648_v48 }
 0x708   :  { %v650_v50 = vsel %vm83_vm1, %v649_v49, 0.0 }
 0x709   :  { %651 = vadd.xlane.f32.xlu1 %v650_v50 }
 0x796   :  { %v652_v53 = vpop.xlane.xlu1 %651 }
 0x797   :  { %v653_v54 = vmul.f32 0.03125, %v652_v53 }
 0x799   :  { %v654_v55 = vadd.f32 1e-05, %v653_v54 }
 0x79b   :  { %928 = vrsqrt.f32 %v654_v55 }
 0x7a5   :  { %v929_v59 = vpop.eup %928 }
 0x7a6   :  { %v656_v60 = vmul.f32 %v929_v59, %v648_v48 }
 0x7a8   :  { %v661_v0 = vmul.f32 %v660_v58, %v656_v60 }
 0x7aa   :  { %v666_v62 = vadd.f32 %v665_v61, %v661_v0 }
 0x7ac   :  { %v667_v63 = vpack.c.bf16 %v666_v62, %v666_v62 }
 0x7ae   :  { %894 = vmatmul.mubr.msk.bf16.vlgmr.msra.gmra.mrb[20].mxu1 %vm83_vm1, %v667_v63 }
 0x881   :  { %v728_v2 = vpop.f32.mrb[20].mxu1 }
 0x882   :  { %v729_v3 = vadd.f32 %v779_v1, %v728_v2  ;;  %v895_v7 = vpop.f32.mrb[21].mxu1 }
 0x883   :  { %v731_v4 = vpop.f32.mrb[22].mxu1 }
 0x884   :  { %734 = vst [vmem:[#allocation5] sm:$0xff] %v729_v3  ;;  %v896_v5 = vpop.f32.mrb[23].mxu1 }
 0x885   :  { %963 = shalt.err (!%p960_p12)
}
 0x886   :  { %s964_s10 = scalar_lea.hbm %s1210_s11, 128 }
 0x887   :  { %p965_p13 = scmp.ne.s32.totalorder %s1210_s11, %s964_s10  ;;  %p968_p0 = scmp.lt.u32.totalorder %s964_s10, %s1210_s11 }
 0x889   :  { %p970_p1 = pnand %p968_p0, %p965_p13 }
 0x88b   :  { %973 = shalt.err (!%p970_p1)
}
 0x88c   :  { %744 = dma.vmem_to_hbm [thread:$0]  %s742_s1, 128, %s1210_s11, [#allocation4]  }
 0x88d   :  { %976 = dma.done.wait [#allocation4], 128  }
 0x88e   :  { %977 = vsyncadd [#allocation4], 4294967168 }
 0x88f   :  { %748 = vsyncpa [#allocation3], 1 }
 0x890   :  { %749 = vsyncpa [#allocation4], 1 }

// kernel: tpu_custom_call.1
= control target key start
LH: loop header
LB: loop body
LE: loop exit
PB: predicated region body
PF: predicated region fallthrough
CT: control target
= control target key end

     0   :  { %16 = vsyncpa [#allocation3], 0  ;;  %s1199_s0 = inlined_call_operand.hbm [shape: bf16[16,32], index: 0, kind: input, shape index: {}]   ;;  %s1200_s1 = inlined_call_operand.vmem [shape: bf16[4,32], index: 1, kind: input, shape index: {}]   ;;  %s1201_s2 = inlined_call_operand.vmem [shape: bf16[32,32], index: 2, kind: input, shape index: {}]   ;;  %s1202_s3 = inlined_call_operand.vmem [shape: bf16[32,32], index: 3, kind: input, shape index: {}]   ;;  %s1203_s4 = inlined_call_operand.vmem [shape: bf16[32,32], index: 4, kind: input, shape index: {}]   ;;  %s1204_s5 = inlined_call_operand.vmem [shape: bf16[32,96], index: 5, kind: input, shape index: {}]   ;;  %s1205_s6 = inlined_call_operand.vmem [shape: bf16[96,32], index: 6, kind: input, shape index: {}]   ;;  %s1206_s7 = inlined_call_operand.vmem [shape: bf16[32,128], index: 7, kind: input, shape index: {}]   ;;  %s1207_s8 = inlined_call_operand.vmem [shape: f32[8,32], index: 8, kind: input, shape index: {}]   ;;  %s1208_s9 = inlined_call_operand.vmem [shape: f32[1,96], index: 9, kind: input, shape index: {}]   ;;  %s1209_s10 = inlined_call_operand.vmem [shape: f32[1,128], index: 10, kind: input, shape index: {}]   ;;  %s1210_s11 = inlined_call_operand.hbm [shape: f32[8,128], index: 11, kind: output, shape index: {}]  }
   0x1   :  { %17 = vsyncpa [#allocation4], 0  ;;  %s978_s17 = smov [#allocation2]   ;;  %s930_s21 = scalar_lea.hbm %s1199_s0, 128 }
   0x2   :  { %s23_s18 = sshll.u32 %s978_s17, 4  ;;  %p931_p0 = scmp.ne.s32.totalorder %s1199_s0, %s930_s21  ;;  %s24_s18 = int_to_ptr.vmem [resolvable:$true] %s23_s18 }
   0x3   :  { %p934_p1 = scmp.lt.u32.totalorder %s930_s21, %s1199_s0 }
   0x5   :  { %p936_p2 = pnand %p934_p1, %p931_p0 }
   0x7   :  { %939 = shalt.err (!%p936_p2)
}
   0x8   :  { %s940_s26 = scalar_lea.vmem %s24_s18, 128  ;;  %p945_p4 = scmp.lt.s32.totalorder %s24_s18, %s24_s18 }
   0x9   :  { %p941_p3 = scmp.ne.s32.totalorder %s24_s18, %s940_s26  ;;  %p946_p5 = scmp.lt.s32.totalorder %s940_s26, %s940_s26 }
   0xb   :  { %p947_p6 = por %p946_p5, %p945_p4 }
   0xd   :  { %p948_p7 = pnand %p947_p6, %p941_p3 }
   0xf   :  { %951 = shalt.err (!%p948_p7)
}
  0x10   :  { %s979_s27 = smov 64   ;;  %s980_s28 = smov 4  }
  0x11   :  { %29 = dma.hbm_to_vmem [thread:$0]  %s1199_s0, 128, %s24_s18, [#allocation3], %s979_s27, %s979_s27, %s980_s28  }
  0x12   :  { %974 = dma.done.wait [#allocation3], 128  }
  0x13   :  { %975 = vsyncadd [#allocation3], 4294967168  ;;  %v981_v0 = vmov 0.0   ;;  %vm982_vm0 = vmmov 0   ;;  %v903_v1 = vld [vmem:[%s1201_s2] sm:$0xff]   ;;  %v904_v2 = vld [vmem:[%s1201_s2 + $0x8] sm:$0xff]   ;;  %v62_v6 = vlaneseq }
  0x14   :  { %817 = vmatprep.subr.bf16.mxu1 %v981_v0  ;;  %821 = vmatprep.mubr.msk.bf16.mxu1 %vm982_vm0, %v981_v0  ;;  %v905_v3 = vld [vmem:[#allocation2] sm:$0xff]   ;;  %vm83_vm1 = vcmask 261120   ;;  %v907_v5 = vld [vmem:[%s1202_s3 + $0x8] sm:$0xff]   ;;  %vm319_vm2 = vcmask 1043456   ;;  %vm290_vm3 = vcmask 60416   ;;  %vm315_vm4 = vcmask 64512  }
  0x15   :  { %833 = vmatprep.subr.bf16.mxu0 %v981_v0  ;;  %835 = vmatprep.mubr.msk.bf16.mxu0 %vm982_vm0, %v981_v0  ;;  %v906_v4 = vld [vmem:[%s1202_s3] sm:$0xff]   ;;  %v1084_v7 = vshrl.u32 %v62_v6, 7  ;;  %v909_v63 = vld [vmem:[%s1203_s4 + $0x8] sm:$0xff]   ;;  %vm598_vm5 = vcmask 785408   ;;  %s983_s19 = smov [#allocation5]  }
  0x16   :  { %818 = vmatpush3.bf16.msra.mxu1 %v903_v1  ;;  %v1090_v9 = vld [vmem:[%s1207_s8] sm:$0xff] }
  0x17   :  { %819 = vmatprep.subr.bf16.mxu1 %v981_v0  ;;  %v64_v8 = vsub.s32 0, %v1084_v7  ;;  %v134_v14 = vsub.s32 1, %v1084_v7  ;;  %v57_v26 = vld [vmem:[%s1200_s1] sm:$0x3]  ;;  %s741_s1 = sshll.u32 %s983_s19, 4  ;;  %s742_s1 = int_to_ptr.vmem [resolvable:$true] %s741_s1 }
  0x18   :  { %v908_v62 = vld [vmem:[%s1203_s4] sm:$0xff]   ;;  %s952_s20 = scalar_lea.vmem %s742_s1, 128  ;;  %p957_p9 = scmp.lt.s32.totalorder %s742_s1, %s742_s1 }
  0x19   :  { %v65_v10 = vrot.slane %v1090_v9, %v64_v8  ;;  %v135_v21 = vrot.slane %v1090_v9, %v134_v14  ;;  %v910_v1 = vld [vmem:[%s1204_s5] sm:$0xff]   ;;  %v911_v14 = vld [vmem:[%s1204_s5 + $0x8] sm:$0xff]   ;;  %p953_p8 = scmp.ne.s32.totalorder %s742_s1, %s952_s20  ;;  %p958_p10 = scmp.lt.s32.totalorder %s952_s20, %s952_s20 }
  0x1a   :  { %820 = vmatpush3.bf16.msra.mxu1 %v904_v2 }
  0x1b   :  { %825 = vmatprep.subr.bf16.mxu1 %v981_v0  ;;  %p959_p11 = por %p958_p10, %p957_p9 }
  0x1d   :  { %822 = vmatmul.mubr.msk.bf16.vlgmr.msra.gmra.mrb[0].mxu1 %vm83_vm1, %v905_v3  ;;  %p960_p12 = pnand %p959_p11, %p953_p8 }
  0x1e   :  { %826 = vmatpush3.bf16.msra.mxu1 %v906_v4  ;;  %829 = vmatprep.mubr.msk.bf16.mxu1 %vm982_vm0, %v981_v0 }
  0x1f   :  { %827 = vmatprep.subr.bf16.mxu1 %v981_v0 }
  0x22   :  { %828 = vmatpush3.bf16.msra.mxu1 %v907_v5 }
  0x23   :  { %839 = vmatprep.subr.bf16.mxu1 %v981_v0 }
  0x25   :  { %830 = vmatmul.mubr.msk.bf16.vlgmr.msra.gmra.mrb[4].mxu1 %vm83_vm1, %v905_v3 }
  0x26   :  { %841 = vmatprep.mubr.msk.bf16.mxu1 %vm982_vm0, %v981_v0 }
  0xf0   :  { %v121_v11 = vpop.f32.mrb[0].mxu1 }
  0xf1   :  { %v122_v12 = vadd.f32 %v121_v11, %v65_v10  ;;  %v823_v13 = vpop.f32.mrb[1].mxu1 }
  0xf2   :  { %v124_v15 = vpop.f32.mrb[2].mxu1 }
  0xf3   :  { %v783_v16 = vpack.c.bf16 %v122_v12, %v122_v12  ;;  %v125_v17 = vadd.f32 %v124_v15, %v65_v10  ;;  %v824_v18 = vpop.f32.mrb[3].mxu1  ;;  %v912_v15 = vld [vmem:[%s1205_s6] sm:$0xff]  }
  0xf4   :  { %v915_v18 = vld [vmem:[%s1205_s6 + $0x18] sm:$0xff]  }
  0xf5   :  { %v784_v19 = vpack.c.bf16 %v125_v17, %v125_v17  ;;  %v205_v20 = vsel %vm83_vm1, %v783_v16, 0  ;;  %v913_v16 = vld [vmem:[%s1205_s6 + $0x8] sm:$0xff]   ;;  %v914_v17 = vld [vmem:[%s1205_s6 + $0x10] sm:$0xff]  }
  0xf6   :  { %834 = vmatpush3.bf16.xpose.msra.mxu0 %v205_v20 }
  0xf7   :  { %v248_v22 = vsel %vm83_vm1, %v784_v19, 0  ;;  %845 = vmatprep.subr.bf16.mxu0 %v981_v0  ;;  %v420_v19 = vsub.s32 2, %v1084_v7 }
  0xf8   :  { %840 = vmatpush3.bf16.xpose.msra.mxu1 %v248_v22  ;;  %v182_v23 = vpop.f32.mrb[4].mxu1 }
  0xf9   :  { %v183_v24 = vadd.f32 %v182_v23, %v135_v21  ;;  %v831_v25 = vpop.f32.mrb[5].mxu1  ;;  %851 = vmatprep.subr.bf16.mxu1 %v981_v0  ;;  %v421_v20 = vrot.slane %v1090_v9, %v420_v19 }
  0xfa   :  { %v185_v27 = vpop.f32.mrb[6].mxu1 }
  0xfb   :  { %v785_v28 = vpack.c.bf16 %v183_v24, %v183_v24  ;;  %v186_v29 = vadd.f32 %v185_v27, %v135_v21  ;;  %v832_v30 = vpop.f32.mrb[7].mxu1  ;;  %v916_v27 = vld [vmem:[%s1205_s6 + $0x20] sm:$0xff]  }
  0xfd   :  { %836 = vmatmul.mubr.msk.bf16.vlgmr.msra.gmra.mrb[0].mxu0 %vm83_vm1, %v57_v26  ;;  %v321_v31 = vsel %vm319_vm2, %v785_v28, 0  ;;  %v786_v32 = vpack.c.bf16 %v186_v29, %v186_v29  ;;  %v917_v28 = vld [vmem:[%s1205_s6 + $0x28] sm:$0xff]   ;;  %v768_v29 = vld [vmem:[%s1208_s9] ss:$0 sm:$0xff] }
  0xfe   :  { %846 = vmatpush3.bf16.msra.mxu0 %v321_v31  ;;  %847 = vmatprep.mubr.msk.bf16.mxu0 %vm982_vm0, %v981_v0 }
  0xff   :  { %842 = vmatmul.mubr.msk.bf16.vlgmr.msra.gmra.mrb[8].mxu1 %vm83_vm1, %v57_v26  ;;  %v367_v33 = vsel %vm319_vm2, %v786_v32, 0  ;;  %857 = vmatprep.subr.bf16.mxu0 %v981_v0 }
 0x100   :  { %852 = vmatpush3.bf16.msra.mxu1 %v367_v33  ;;  %853 = vmatprep.mubr.msk.bf16.mxu1 %vm982_vm0, %v981_v0 }
 0x101   :  { %865 = vmatprep.subr.bf16.mxu1 %v981_v0 }
 0x1d0   :  { %v241_v34 = vpop.f32.mrb[0].mxu0 }
 0x1d1   :  { %v837_v35 = vpop.f32.mrb[1].mxu0  ;;  %v291_v36 = vsel %vm290_vm3, %v241_v34, -inf }
 0x1d2   :  { %v284_v37 = vpop.f32.mrb[8].mxu1  ;;  %292 = vmax.xlane.f32.xlu0 %v291_v36  ;;  %v244_v38 = vpop.f32.mrb[2].mxu0 }
 0x1d3   :  { %v838_v39 = vpop.f32.mrb[3].mxu0  ;;  %v843_v40 = vpop.f32.mrb[9].mxu1  ;;  %v294_v41 = vsel %vm290_vm3, %v284_v37, -inf }
 0x1d4   :  { %v287_v42 = vpop.f32.mrb[10].mxu1 }
 0x1d5   :  { %v844_v43 = vpop.f32.mrb[11].mxu1 }
 0x1d6   :  { %295 = vmax.xlane.f32.xlu0 %v294_v41 }
 0x25f   :  { %v293_v44 = vpop.xlane.xlu0 %292 }
 0x260   :  { %v297_v45 = vsub.f32 %v241_v34, %v293_v44 }
 0x262   :  { %v299_v46 = vmul.f32 1.442695, %v297_v45 }
 0x263   :  { %v296_v47 = vpop.xlane.xlu0 %295 }
 0x264   :  { %920 = vpow2.f32 %v299_v46  ;;  %v298_v48 = vsub.f32 %v284_v37, %v296_v47  ;;  %v560_v37 = vsub.s32 3, %v1084_v7 }
 0x266   :  { %v301_v49 = vmul.f32 1.442695, %v298_v48  ;;  %v561_v38 = vrot.slane %v1090_v9, %v560_v37 }
 0x268   :  { %922 = vpow2.f32 %v301_v49 }
 0x26e   :  { %v921_v50 = vpop.eup %920 }
 0x26f   :  { %v303_v51 = vsel %vm290_vm3, %v921_v50, 0.0 }
 0x270   :  { %304 = vadd.xlane.f32.xlu1 %v303_v51  ;;  %v918_v51 = vld [vmem:[%s1206_s7] sm:$0xff]  }
 0x272   :  { %v923_v52 = vpop.eup %922 }
 0x273   :  { %v306_v53 = vsel %vm290_vm3, %v923_v52, 0.0 }
 0x274   :  { %307 = vadd.xlane.f32.xlu1 %v306_v53 }
 0x2fd   :  { %v305_v54 = vpop.xlane.xlu1 %304 }
 0x2fe   :  { %924 = vrcp.f32 %v305_v54 }
 0x301   :  { %v308_v55 = vpop.xlane.xlu1 %307 }
 0x302   :  { %926 = vrcp.f32 %v308_v55 }
 0x308   :  { %v925_v56 = vpop.eup %924 }
 0x309   :  { %v311_v57 = vmul.f32 %v925_v56, %v921_v50  ;;  %v659_v56 = vsub.s32 4, %v1084_v7 }
 0x30b   :  { %v313_v58 = vpack.c.bf16 %v311_v57, %v311_v57  ;;  %v664_v57 = vsub.s32 5, %v1084_v7 }
 0x30c   :  { %v927_v59 = vpop.eup %926 }
 0x30d   :  { %v312_v60 = vmul.f32 %v927_v59, %v923_v52  ;;  %848 = vmatmul.mubr.msk.bf16.vlgmr.msra.gmra.mrb[4].mxu0 %vm315_vm4, %v313_v58  ;;  %v919_v52 = vld [vmem:[%s1206_s7 + $0x8] sm:$0xff]   ;;  %v660_v58 = vrot.slane %v1090_v9, %v659_v56 }
 0x30e   :  { %861 = vmatprep.mubr.msk.bf16.mxu0 %vm982_vm0, %v981_v0  ;;  %858 = vmatpush3.bf16.msra.mxu0 %v908_v62 }
 0x30f   :  { %v314_v61 = vpack.c.bf16 %v312_v60, %v312_v60  ;;  %859 = vmatprep.subr.bf16.mxu0 %v981_v0 }
 0x311   :  { %854 = vmatmul.mubr.msk.bf16.vlgmr.msra.gmra.mrb[12].mxu1 %vm315_vm4, %v314_v61  ;;  %v665_v61 = vrot.slane %v1090_v9, %v664_v57 }
 0x312   :  { %869 = vmatprep.mubr.msk.bf16.mxu1 %vm982_vm0, %v981_v0  ;;  %860 = vmatpush3.bf16.msra.mxu0 %v909_v63 }
 0x313   :  { %873 = vmatprep.subr.bf16.mxu0 %v981_v0  ;;  %866 = vmatpush3.bf16.msra.mxu1 %v910_v1  ;;  %v779_v1 = vld [vmem:[%s1209_s10] ss:$0 sm:$0xff] }
 0x314   :  { %867 = vmatprep.subr.bf16.mxu1 %v981_v0 }
 0x317   :  { %868 = vmatpush3.bf16.msra.mxu1 %v911_v14 }
 0x318   :  { %889 = vmatprep.subr.bf16.mxu1 %v981_v0 }
 0x3e0   :  { %v357_v2 = vpop.f32.mrb[4].mxu0 }
 0x3e1   :  { %v849_v3 = vpop.f32.mrb[5].mxu0 }
 0x3e2   :  { %v360_v4 = vpop.f32.mrb[6].mxu0 }
 0x3e3   :  { %v850_v5 = vpop.f32.mrb[7].mxu0 }
 0x3e4   :  { %v403_v6 = vpop.f32.mrb[12].mxu1 }
 0x3e5   :  { %v411_v8 = vcombine.low %v357_v2, %v403_v6  ;;  %v855_v10 = vpop.f32.mrb[13].mxu1 }
 0x3e6   :  { %v406_v11 = vpop.f32.mrb[14].mxu1 }
 0x3e7   :  { %v413_v12 = vpack.c.bf16 %v411_v8, %v411_v8  ;;  %v856_v13 = vpop.f32.mrb[15].mxu1 }
 0x3e9   :  { %862 = vmatmul.mubr.msk.bf16.vlgmr.msra.gmra.mrb[8].mxu0 %vm83_vm1, %v413_v12 }
 0x3ea   :  { %885 = vmatprep.mubr.msk.bf16.mxu0 %vm982_vm0, %v981_v0  ;;  %874 = vmatpush3.bf16.msra.mxu0 %v912_v15 }
 0x3eb   :  { %875 = vmatprep.subr.bf16.mxu0 %v981_v0 }
 0x3ee   :  { %876 = vmatpush3.bf16.msra.mxu0 %v913_v16 }
 0x3ef   :  { %877 = vmatprep.subr.bf16.mxu0 %v981_v0 }
 0x3f2   :  { %878 = vmatpush3.bf16.msra.mxu0 %v914_v17 }
 0x3f3   :  { %879 = vmatprep.subr.bf16.mxu0 %v981_v0 }
 0x3f6   :  { %880 = vmatpush3.bf16.msra.mxu0 %v915_v18 }
 0x3f7   :  { %881 = vmatprep.subr.bf16.mxu0 %v981_v0 }
 0x3fa   :  { %882 = vmatpush3.bf16.msra.mxu0 %v916_v27 }
 0x3fb   :  { %883 = vmatprep.subr.bf16.mxu0 %v981_v0 }
 0x3fe   :  { %884 = vmatpush3.bf16.msra.mxu0 %v917_v28 }
 0x4bc   :  { %v471_v21 = vpop.f32.mrb[8].mxu0 }
 0x4bd   :  { %v472_v22 = vadd.f32 %v471_v21, %v421_v20  ;;  %v863_v23 = vpop.f32.mrb[9].mxu0 }
 0x4be   :  { %v474_v24 = vpop.f32.mrb[10].mxu0 }
 0x4bf   :  { %v477_v25 = vpack.c.bf16 %v472_v22, %v472_v22  ;;  %v864_v26 = vpop.f32.mrb[11].mxu0 }
 0x4c1   :  { %870 = vmatmul.mubr.msk.bf16.vlgmr.msra.gmra.mrb[16].mxu1 %vm83_vm1, %v477_v25 }
 0x4c2   :  { %893 = vmatprep.mubr.msk.bf16.mxu1 %vm982_vm0, %v981_v0  ;;  %890 = vmatpush3.bf16.msra.mxu1 %v918_v51 }
 0x4c3   :  { %891 = vmatprep.subr.bf16.mxu1 %v981_v0 }
 0x4c6   :  { %892 = vmatpush3.bf16.msra.mxu1 %v919_v52 }
 0x594   :  { %v538_v30 = vpop.f32.mrb[16].mxu1 }
 0x595   :  { %v539_v31 = vadd.f32 %v768_v29, %v538_v30  ;;  %v871_v32 = vpop.f32.mrb[17].mxu1 }
 0x596   :  { %v541_v33 = vpop.f32.mrb[18].mxu1 }
 0x597   :  { %v544_v34 = vmax.f32 %v539_v31, 0.0  ;;  %v872_v35 = vpop.f32.mrb[19].mxu1 }
 0x599   :  { %v545_v36 = vpack.c.bf16 %v544_v34, %v544_v34 }
 0x59b   :  { %886 = vmatmul.mubr.msk.bf16.vlgmr.msra.gmra.mrb[12].mxu0 %vm598_vm5, %v545_v36 }
 0x66e   :  { %v636_v39 = vpop.f32.mrb[12].mxu0 }
 0x66f   :  { %v637_v40 = vadd.f32 %v636_v39, %v561_v38  ;;  %v887_v41 = vpop.f32.mrb[13].mxu0 }
 0x670   :  { %v639_v42 = vpop.f32.mrb[14].mxu0 }
 0x671   :  { %v888_v43 = vpop.f32.mrb[15].mxu0  ;;  %v642_v44 = vadd.f32 %v637_v40, %v472_v22 }
 0x673   :  { %v643_v45 = vsel %vm83_vm1, %v642_v44, 0.0 }
 0x674   :  { %644 = vadd.xlane.f32.xlu0 %v643_v45 }
 0x701   :  { %v645_v46 = vpop.xlane.xlu0 %644 }
 0x702   :  { %v647_v47 = vmul.f32 0.03125, %v645_v46 }
 0x704   :  { %v648_v48 = vsub.f32 %v642_v44, %v647_v47 }
 0x706   :  { %v649_v49 = vmul.f32 %v648_v48, %v648_v48 }
 0x708   :  { %v650_v50 = vsel %vm83_vm1, %v649_v49, 0.0 }
 0x709   :  { %651 = vadd.xlane.f32.xlu1 %v650_v50 }
 0x796   :  { %v652_v53 = vpop.xlane.xlu1 %651 }
 0x797   :  { %v653_v54 = vmul.f32 0.03125, %v652_v53 }
 0x799   :  { %v654_v55 = vadd.f32 1e-05, %v653_v54 }
 0x79b   :  { %928 = vrsqrt.f32 %v654_v55 }
 0x7a5   :  { %v929_v59 = vpop.eup %928 }
 0x7a6   :  { %v656_v60 = vmul.f32 %v929_v59, %v648_v48 }
 0x7a8   :  { %v661_v0 = vmul.f32 %v660_v58, %v656_v60 }
 0x7aa   :  { %v666_v62 = vadd.f32 %v665_v61, %v661_v0 }
 0x7ac   :  { %v667_v63 = vpack.c.bf16 %v666_v62, %v666_v62 }
 0x7ae   :  { %894 = vmatmul.mubr.msk.bf16.vlgmr.msra.gmra.mrb[20].mxu1 %vm83_vm1, %v667_v63 }
 0x881   :  { %v728_v2 = vpop.f32.mrb[20].mxu1 }
 0x882   :  { %v729_v3 = vadd.f32 %v779_v1, %v728_v2  ;;  %v895_v7 = vpop.f32.mrb[21].mxu1 }
 0x883   :  { %v731_v4 = vpop.f32.mrb[22].mxu1 }
 0x884   :  { %734 = vst [vmem:[#allocation5] sm:$0xff] %v729_v3  ;;  %v896_v5 = vpop.f32.mrb[23].mxu1 }
 0x885   :  { %963 = shalt.err (!%p960_p12)
}
 0x886   :  { %s964_s10 = scalar_lea.hbm %s1210_s11, 128 }
 0x887   :  { %p965_p13 = scmp.ne.s32.totalorder %s1210_s11, %s964_s10  ;;  %p968_p0 = scmp.lt.u32.totalorder %s964_s10, %s1210_s11 }
 0x889   :  { %p970_p1 = pnand %p968_p0, %p965_p13 }
 0x88b   :  { %973 = shalt.err (!%p970_p1)
}
 0x88c   :  { %744 = dma.vmem_to_hbm [thread:$0]  %s742_s1, 128, %s1210_s11, [#allocation4]  }
 0x88d   :  { %976 = dma.done.wait [#allocation4], 128  }
 0x88e   :  { %977 = vsyncadd [#allocation4], 4294967168 }
 0x88f   :  { %748 = vsyncpa [#allocation3], 1 }
 0x890   :  { %749 = vsyncpa [#allocation4], 1 }

</bundles_post_ra>
